<compile_context>
chip_gen: v6e
topology: v6e:2x2x1
jax: 0.10.0
libtpu: 0.0.40
codegen_flags: <defaults>
</compile_context>

<pallas_src>
import math

import jax
import jax.numpy as jnp
from jax.experimental import pallas as pl
from jax.experimental.pallas import tpu as pltpu


# ----------------------------------------------------------------------------
# Pallas kernel: whole GAAT layer for a block of Bb batch elements per step.
# ----------------------------------------------------------------------------
def gaat_kernel(
    # inputs
    q_ref,                                   # (Bb*L, D)   flattened query rows
    wq_ref, bq_ref, wk_ref, bk_ref,          # attn projections
    wv_ref, bv_ref, wo_ref, bo_ref,
    wh_ref, bh_ref,                          # head-attention gate (D,H), (1,H)
    wqg_ref, wcg_ref, bcg_ref,               # gate rows (1,D), (1,D), (1,1)
    w1_ref, b1_ref, w2_ref, b2_ref,          # ResMLP
    gamma_ref, beta_ref,                     # LayerNorm
    # outputs
    out_ref,                                 # (Bb*L, D)
    attn_ref,                                # (Bb, H, L, L)
    # scratch
    ctx_scr,                                 # VMEM (Bb*L, D) f32
):
    N, D = q_ref.shape
    Bb, H, L, _ = attn_ref.shape
    dh = D // H
    scale = 1.0 / math.sqrt(dh)

    x = q_ref[...].astype(jnp.float32)                       # (N, D)

    # --- dense projections on the whole (Bb*L, D) slab (big MXU M dim) -------
    Q = jnp.dot(x, wq_ref[...], preferred_element_type=jnp.float32) + bq_ref[...]
    K = jnp.dot(x, wk_ref[...], preferred_element_type=jnp.float32) + bk_ref[...]
    V = jnp.dot(x, wv_ref[...], preferred_element_type=jnp.float32) + bv_ref[...]

    # --- per-token head weights ("head attended") -----------------------------
    hl = jnp.dot(x, wh_ref[...], preferred_element_type=jnp.float32) + bh_ref[...]
    hl = hl - jnp.max(hl, axis=-1, keepdims=True)
    he = jnp.exp(hl)
    head_w = he * (1.0 / jnp.sum(he, axis=-1, keepdims=True))  # (N, H)

    # --- per-batch, per-head attention ----------------------------------------
    # Un-gated softmax goes straight to attn_ref; context is accumulated through
    # Wo row-slices (no lane concat, no explicit K transpose).
    trans_b = (((1,), (1,)), ((), ()))                        # A @ B^T
    for b in range(Bb):
        r0 = b * L
        Qb = Q[r0:r0 + L]                                     # (L, D)
        Kb = K[r0:r0 + L]
        Vb = V[r0:r0 + L]
        hwb = head_w[r0:r0 + L]                               # (L, H)
        ctx_b = jnp.zeros((L, D), jnp.float32) + bo_ref[...]  # start with bias
        for h in range(H):
            c0 = h * dh
            Qh = Qb[:, c0:c0 + dh]
            Kh = Kb[:, c0:c0 + dh]
            Vh = Vb[:, c0:c0 + dh]
            s = jax.lax.dot_general(
                Qh, Kh, trans_b,
                preferred_element_type=jnp.float32) * scale   # (L, L)
            s = s - jnp.max(s, axis=-1, keepdims=True)
            e = jnp.exp(s)
            a = e * (1.0 / jnp.sum(e, axis=-1, keepdims=True))
            attn_ref[b, h] = a.astype(attn_ref.dtype)         # un-gated store
            wctx = jnp.dot(a, Vh,
                           preferred_element_type=jnp.float32) * hwb[:, h:h + 1]
            ctx_b = ctx_b + jnp.dot(
                wctx, wo_ref[pl.ds(c0, dh), :],
                preferred_element_type=jnp.float32)
        ctx_scr[pl.ds(r0, L), :] = ctx_b

    context = ctx_scr[...]                                    # (N, D)

    # --- gating (VPU multiply + lane reduce instead of (D,1) matmuls) --------
    g_logit = (jnp.sum(x * wqg_ref[...], axis=-1, keepdims=True)
               + jnp.sum(context * wcg_ref[...], axis=-1, keepdims=True)
               + bcg_ref[...])                                # (N, 1)
    gate = jax.nn.sigmoid(g_logit)
    fusion = x * gate + context * (1.0 - gate)

    # --- ResMLP (residual two-layer MLP, dropout = identity) -----------------
    h1 = jnp.maximum(
        jnp.dot(fusion, w1_ref[...], preferred_element_type=jnp.float32)
        + b1_ref[...], 0.0)
    mlp = fusion + (jnp.dot(h1, w2_ref[...], preferred_element_type=jnp.float32)
                    + b2_ref[...])

    # --- LayerNorm ------------------------------------------------------------
    mean = jnp.mean(mlp, axis=-1, keepdims=True)
    var = jnp.mean((mlp - mean) ** 2, axis=-1, keepdims=True)
    normed = (mlp - mean) * jax.lax.rsqrt(var + 1e-5)
    out_ref[...] = (normed * gamma_ref[...] + beta_ref[...]).astype(out_ref.dtype)

    # --- attn.mul_(gate.unsqueeze(1)) : read back tile-by-tile and gate -------
    for b in range(Bb):
        gb = gate[b * L:(b + 1) * L]                          # (L, 1)
        for h in range(H):
            attn_ref[b, h] = (attn_ref[b, h] * gb).astype(attn_ref.dtype)


# ----------------------------------------------------------------------------
# Wrapper
# ----------------------------------------------------------------------------
def _pick_block_batch(B, L, max_bb=8):
    for bb in range(min(B, max_bb), 0, -1):
        if B % bb == 0 and (bb == B or (bb * L) % 8 == 0):
            return bb
    return B


def gaat_layer(query, params, heads, block_batch=None):
    B, L, D = query.shape
    assert D % heads == 0, "model_dim must be divisible by heads"
    Bb = _pick_block_batch(B, L) if block_batch is None else block_batch
    assert B % Bb == 0
    nb = B // Bb
    dh = D // heads

    # wqg / wcg are passed transposed (row form) so the kernel can use a
    # VPU multiply + reduction instead of an N=1 MXU matmul.
    wdict = dict(params)
    wdict["wqg"] = params["wqg"].T                            # (1, D)
    wdict["wcg"] = params["wcg"].T                            # (1, D)

    weight_names = [
        "wq", "bq", "wk", "bk", "wv", "bv", "wo", "bo",
        "wh", "bh", "wqg", "wcg", "bcg",
        "w1", "b1", "w2", "b2", "gamma", "beta",
    ]
    wlist = [wdict[n] for n in weight_names]

    def full_spec(shape):
        n = len(shape)
        # NOTE: constant index map -> Pallas re-uses the same block each step;
        # for very large D also consider pipeline_mode=pl.Buffered(1) to halve
        # the weight VMEM footprint.
        return pl.BlockSpec(shape, lambda i, _n=n: (0,) * _n)

    q_flat = query.reshape(B * L, D)                          # lane-dense rows

    in_specs = [pl.BlockSpec((Bb * L, D), lambda i: (i, 0))]
    in_specs += [full_spec(w.shape) for w in wlist]

    out_specs = [
        pl.BlockSpec((Bb * L, D), lambda i: (i, 0)),
        pl.BlockSpec((Bb, heads, L, L), lambda i: (i, 0, 0, 0)),
    ]
    out_shape = (
        jax.ShapeDtypeStruct((B * L, D), jnp.float32),
        jax.ShapeDtypeStruct((B, heads, L, L), jnp.float32),
    )

    # Advisory cost estimate for XLA's scheduler.
    flops = B * (2 * L * D * D * 6            # wq,wk,wv,wo(split),w1,w2
                 + 2 * L * D * heads          # head gate
                 + 4 * heads * L * L * dh     # scores + ctx
                 + 8 * L * D)                 # elementwise-ish
    transcendentals = B * L * (heads * L + heads + 2)
    bytes_accessed = 4 * (2 * B * L * D + B * heads * L * L
                          + sum(int(w.size) for w in wlist))

    out_flat, attn = pl.pallas_call(
        gaat_kernel,
        out_shape=out_shape,
        grid_spec=pltpu.PrefetchScalarGridSpec(
            num_scalar_prefetch=0,
            grid=(nb,),
            in_specs=in_specs,
            out_specs=out_specs,
            scratch_shapes=[pltpu.VMEM((Bb * L, D), jnp.float32)],
        ),
        compiler_params=pltpu.CompilerParams(
            dimension_semantics=("parallel",)),
        cost_estimate=pl.CostEstimate(
            flops=flops, transcendentals=transcendentals,
            bytes_accessed=bytes_accessed),
    )(q_flat, *wlist)

    return out_flat.reshape(B, L, D), attn


# ----------------------------------------------------------------------------
# Pure-JAX reference (same assumed semantics) for correctness checking.
# ----------------------------------------------------------------------------
def gaat_reference(query, p, heads):
    B, L, D = query.shape
    dh = D // heads
    q = query.astype(jnp.float32)

    Q = q @ p["wq"] + p["bq"]
    K = q @ p["wk"] + p["bk"]
    V = q @ p["wv"] + p["bv"]
    head_w = jax.nn.softmax(q @ p["wh"] + p["bh"], axis=-1)          # (B,L,H)

    Qh = Q.reshape(B, L, heads, dh).transpose(0, 2, 1, 3)
    Kh = K.reshape(B, L, heads, dh).transpose(0, 2, 1, 3)
    Vh = V.reshape(B, L, heads, dh).transpose(0, 2, 1, 3)
    s = jnp.einsum("bhqd,bhkd->bhqk", Qh, Kh) / math.sqrt(dh)
    attn = jax.nn.softmax(s, axis=-1)                                 # (B,H,L,L)
    ctx = jnp.einsum("bhqk,bhkd->bhqd", attn, Vh)
    ctx = ctx * head_w.transpose(0, 2, 1)[..., None]
    concat = ctx.transpose(0, 2, 1, 3).reshape(B, L, D)
    context = concat @ p["wo"] + p["bo"]

    gate = jax.nn.sigmoid(q @ p["wqg"] + context @ p["wcg"] + p["bcg"])
    fusion = q * gate + context * (1.0 - gate)
    h1 = jax.nn.relu(fusion @ p["w1"] + p["b1"])
    mlp = fusion + h1 @ p["w2"] + p["b2"]
    mean = jnp.mean(mlp, axis=-1, keepdims=True)
    var = jnp.mean((mlp - mean) ** 2, axis=-1, keepdims=True)
    out = (mlp - mean) * jax.lax.rsqrt(var + 1e-5) * p["gamma"] + p["beta"]
    attn_gated = attn * gate[:, None, :, :]
    return out, attn_gated


# ----------------------------------------------------------------------------
# Deterministic parameter init + driver
# ----------------------------------------------------------------------------
def init_params(key, D, heads):
    ks = jax.random.split(key, 16)
    s = 1.0 / math.sqrt(D)
    return {
        "wq": jax.random.normal(ks[0], (D, D), jnp.float32) * s,
        "bq": jax.random.normal(ks[1], (1, D), jnp.float32) * 0.01,
        "wk": jax.random.normal(ks[2], (D, D), jnp.float32) * s,
        "bk": jax.random.normal(ks[3], (1, D), jnp.float32) * 0.01,
        "wv": jax.random.normal(ks[4], (D, D), jnp.float32) * s,
        "bv": jax.random.normal(ks[5], (1, D), jnp.float32) * 0.01,
        "wo": jax.random.normal(ks[6], (D, D), jnp.float32) * s,
        "bo": jax.random.normal(ks[7], (1, D), jnp.float32) * 0.01,
        "wh": jax.random.normal(ks[8], (D, heads), jnp.float32) * s,
        "bh": jnp.zeros((1, heads), jnp.float32),
        "wqg": jax.random.normal(ks[9], (D, 1), jnp.float32) * s,
        "wcg": jax.random.normal(ks[10], (D, 1), jnp.float32) * s,
        "bcg": jnp.zeros((1, 1), jnp.float32),
        "w1": jax.random.normal(ks[11], (D, D), jnp.float32) * s,
        "b1": jax.random.normal(ks[12], (1, D), jnp.float32) * 0.01,
        "w2": jax.random.normal(ks[13], (D, D), jnp.float32) * s,
        "b2": jax.random.normal(ks[14], (1, D), jnp.float32) * 0.01,
        "gamma": jnp.ones((1, D), jnp.float32),
        "beta": jnp.zeros((1, D), jnp.float32),
    }


if __name__ == "__main__":
    B, L, D, H = 2, 8, 32, 4
    key = jax.random.PRNGKey(0)
    k_x, k_p = jax.random.split(key)
    query = jax.random.normal(k_x, (B, L, D), jnp.float32)
    params = init_params(k_p, D, H)

    out, attn = gaat_layer(query, params, H)
    out, attn = jax.block_until_ready((out, attn))

    ref_out, ref_attn = gaat_reference(query, params, H)
    assert jnp.allclose(out, ref_out, rtol=1e-4, atol=1e-4), "output mismatch"
    assert jnp.allclose(attn, ref_attn, rtol=1e-4, atol=1e-4), "attn mismatch"

    print("KERNEL_OK")
</pallas_src>

<mosaic_0001>
module attributes {stable_mosaic.version = 11 : i64} {
  func.func @gaat_kernel(%arg0: i32, %arg1: memref<16x32xf32, #tpu.memory_space<vmem>>, %arg2: memref<32x32xf32, #tpu.memory_space<vmem>>, %arg3: memref<1x32xf32, #tpu.memory_space<vmem>>, %arg4: memref<32x32xf32, #tpu.memory_space<vmem>>, %arg5: memref<1x32xf32, #tpu.memory_space<vmem>>, %arg6: memref<32x32xf32, #tpu.memory_space<vmem>>, %arg7: memref<1x32xf32, #tpu.memory_space<vmem>>, %arg8: memref<32x32xf32, #tpu.memory_space<vmem>>, %arg9: memref<1x32xf32, #tpu.memory_space<vmem>>, %arg10: memref<32x4xf32, #tpu.memory_space<vmem>>, %arg11: memref<1x4xf32, #tpu.memory_space<vmem>>, %arg12: memref<1x32xf32, #tpu.memory_space<vmem>>, %arg13: memref<1x32xf32, #tpu.memory_space<vmem>>, %arg14: memref<1x1xf32, #tpu.memory_space<vmem>>, %arg15: memref<32x32xf32, #tpu.memory_space<vmem>>, %arg16: memref<1x32xf32, #tpu.memory_space<vmem>>, %arg17: memref<32x32xf32, #tpu.memory_space<vmem>>, %arg18: memref<1x32xf32, #tpu.memory_space<vmem>>, %arg19: memref<1x32xf32, #tpu.memory_space<vmem>>, %arg20: memref<1x32xf32, #tpu.memory_space<vmem>>, %arg21: memref<16x32xf32, #tpu.memory_space<vmem>>, %arg22: memref<2x4x8x8xf32, #tpu.memory_space<vmem>>, %arg23: memref<16x32xf32, #tpu.memory_space<vmem>>) attributes {dimension_semantics = [#tpu.dimension_semantics<parallel>], iteration_bounds = array<i64: 1>, scalar_prefetch = 0 : i64, scratch_operands = 1 : i64, tpu.core_type = #tpu.core_type<tc>, window_params = [{transform_indices = @transform_0, window_bounds = array<i64: 16, 32>}, {pipeline_mode = #tpu.pipeline_mode<synchronous>, transform_indices = @transform_1, window_bounds = array<i64: 32, 32>}, {pipeline_mode = #tpu.pipeline_mode<synchronous>, transform_indices = @transform_2, window_bounds = array<i64: 1, 32>}, {pipeline_mode = #tpu.pipeline_mode<synchronous>, transform_indices = @transform_3, window_bounds = array<i64: 32, 32>}, {pipeline_mode = #tpu.pipeline_mode<synchronous>, transform_indices = @transform_4, window_bounds = array<i64: 1, 32>}, {pipeline_mode = #tpu.pipeline_mode<synchronous>, transform_indices = @transform_5, window_bounds = array<i64: 32, 32>}, {pipeline_mode = #tpu.pipeline_mode<synchronous>, transform_indices = @transform_6, window_bounds = array<i64: 1, 32>}, {pipeline_mode = #tpu.pipeline_mode<synchronous>, transform_indices = @transform_7, window_bounds = array<i64: 32, 32>}, {pipeline_mode = #tpu.pipeline_mode<synchronous>, transform_indices = @transform_8, window_bounds = array<i64: 1, 32>}, {pipeline_mode = #tpu.pipeline_mode<synchronous>, transform_indices = @transform_9, window_bounds = array<i64: 32, 4>}, {pipeline_mode = #tpu.pipeline_mode<synchronous>, transform_indices = @transform_10, window_bounds = array<i64: 1, 4>}, {pipeline_mode = #tpu.pipeline_mode<synchronous>, transform_indices = @transform_11, window_bounds = array<i64: 1, 32>}, {pipeline_mode = #tpu.pipeline_mode<synchronous>, transform_indices = @transform_12, window_bounds = array<i64: 1, 32>}, {pipeline_mode = #tpu.pipeline_mode<synchronous>, transform_indices = @transform_13, window_bounds = array<i64: 1, 1>}, {pipeline_mode = #tpu.pipeline_mode<synchronous>, transform_indices = @transform_14, window_bounds = array<i64: 32, 32>}, {pipeline_mode = #tpu.pipeline_mode<synchronous>, transform_indices = @transform_15, window_bounds = array<i64: 1, 32>}, {pipeline_mode = #tpu.pipeline_mode<synchronous>, transform_indices = @transform_16, window_bounds = array<i64: 32, 32>}, {pipeline_mode = #tpu.pipeline_mode<synchronous>, transform_indices = @transform_17, window_bounds = array<i64: 1, 32>}, {pipeline_mode = #tpu.pipeline_mode<synchronous>, transform_indices = @transform_18, window_bounds = array<i64: 1, 32>}, {pipeline_mode = #tpu.pipeline_mode<synchronous>, transform_indices = @transform_19, window_bounds = array<i64: 1, 32>}, {transform_indices = @transform_20, window_bounds = array<i64: 16, 32>}, {transform_indices = @transform_21, window_bounds = array<i64: 2, 4, 8, 8>}]} {
    %c0 = arith.constant 0 : index
    %c0_0 = arith.constant 0 : index
    %0 = vector.load %arg1[%c0, %c0_0] : memref<16x32xf32, #tpu.memory_space<vmem>>, vector<16x32xf32>
    %c0_1 = arith.constant 0 : index
    %c0_2 = arith.constant 0 : index
    %1 = vector.load %arg2[%c0_1, %c0_2] : memref<32x32xf32, #tpu.memory_space<vmem>>, vector<32x32xf32>
    %cst = arith.constant dense<0.000000e+00> : vector<16x32xf32>
    %2 = tpu.matmul %0, %1, %cst {dimension_numbers = #tpu.dot_dimension_numbers<[1], [0], [0], [1], [0, 0, 1, 1], [], []>} : vector<16x32xf32>, vector<32x32xf32>, vector<16x32xf32> -> vector<16x32xf32>
    %c0_3 = arith.constant 0 : index
    %c0_4 = arith.constant 0 : index
    %3 = vector.load %arg3[%c0_3, %c0_4] : memref<1x32xf32, #tpu.memory_space<vmem>>, vector<1x32xf32>
    %4 = vector.broadcast %3 : vector<1x32xf32> to vector<16x32xf32>
    %5 = arith.addf %2, %4 : vector<16x32xf32>
    %c0_5 = arith.constant 0 : index
    %c0_6 = arith.constant 0 : index
    %6 = vector.load %arg4[%c0_5, %c0_6] : memref<32x32xf32, #tpu.memory_space<vmem>>, vector<32x32xf32>
    %cst_7 = arith.constant dense<0.000000e+00> : vector<16x32xf32>
    %7 = tpu.matmul %0, %6, %cst_7 {dimension_numbers = #tpu.dot_dimension_numbers<[1], [0], [0], [1], [0, 0, 1, 1], [], []>} : vector<16x32xf32>, vector<32x32xf32>, vector<16x32xf32> -> vector<16x32xf32>
    %c0_8 = arith.constant 0 : index
    %c0_9 = arith.constant 0 : index
    %8 = vector.load %arg5[%c0_8, %c0_9] : memref<1x32xf32, #tpu.memory_space<vmem>>, vector<1x32xf32>
    %9 = vector.broadcast %8 : vector<1x32xf32> to vector<16x32xf32>
    %10 = arith.addf %7, %9 : vector<16x32xf32>
    %c0_10 = arith.constant 0 : index
    %c0_11 = arith.constant 0 : index
    %11 = vector.load %arg6[%c0_10, %c0_11] : memref<32x32xf32, #tpu.memory_space<vmem>>, vector<32x32xf32>
    %cst_12 = arith.constant dense<0.000000e+00> : vector<16x32xf32>
    %12 = tpu.matmul %0, %11, %cst_12 {dimension_numbers = #tpu.dot_dimension_numbers<[1], [0], [0], [1], [0, 0, 1, 1], [], []>} : vector<16x32xf32>, vector<32x32xf32>, vector<16x32xf32> -> vector<16x32xf32>
    %c0_13 = arith.constant 0 : index
    %c0_14 = arith.constant 0 : index
    %13 = vector.load %arg7[%c0_13, %c0_14] : memref<1x32xf32, #tpu.memory_space<vmem>>, vector<1x32xf32>
    %14 = vector.broadcast %13 : vector<1x32xf32> to vector<16x32xf32>
    %15 = arith.addf %12, %14 : vector<16x32xf32>
    %c0_15 = arith.constant 0 : index
    %c0_16 = arith.constant 0 : index
    %16 = vector.load %arg10[%c0_15, %c0_16] : memref<32x4xf32, #tpu.memory_space<vmem>>, vector<32x4xf32>
    %cst_17 = arith.constant dense<0.000000e+00> : vector<16x4xf32>
    %17 = tpu.matmul %0, %16, %cst_17 {dimension_numbers = #tpu.dot_dimension_numbers<[1], [0], [0], [1], [0, 0, 1, 1], [], []>} : vector<16x32xf32>, vector<32x4xf32>, vector<16x4xf32> -> vector<16x4xf32>
    %c0_18 = arith.constant 0 : index
    %c0_19 = arith.constant 0 : index
    %18 = vector.load %arg11[%c0_18, %c0_19] : memref<1x4xf32, #tpu.memory_space<vmem>>, vector<1x4xf32>
    %19 = vector.broadcast %18 : vector<1x4xf32> to vector<16x4xf32>
    %20 = arith.addf %17, %19 : vector<16x4xf32>
    %cst_20 = arith.constant dense<0xFF800000> : vector<16xf32>
    %21 = vector.multi_reduction <maximumf>, %20, %cst_20 [1] : vector<16x4xf32> to vector<16xf32>
    %22 = vector.shape_cast %21 : vector<16xf32> to vector<16x1xf32>
    %23 = vector.broadcast %22 : vector<16x1xf32> to vector<16x4xf32>
    %24 = arith.subf %20, %23 : vector<16x4xf32>
    %25 = math.exp %24 : vector<16x4xf32>
    %cst_21 = arith.constant dense<0.000000e+00> : vector<16xf32>
    %26 = vector.multi_reduction <add>, %25, %cst_21 [1] : vector<16x4xf32> to vector<16xf32>
    %27 = vector.shape_cast %26 : vector<16xf32> to vector<16x1xf32>
    %cst_22 = arith.constant 1.000000e+00 : f32
    %28 = vector.broadcast %cst_22 : f32 to vector<16x1xf32>
    %29 = arith.divf %28, %27 : vector<16x1xf32>
    %30 = vector.broadcast %29 : vector<16x1xf32> to vector<16x4xf32>
    %31 = arith.mulf %25, %30 : vector<16x4xf32>
    %32 = vector.extract_strided_slice %5 {offsets = [0, 0], sizes = [8, 32], strides = [1, 1]} : vector<16x32xf32> to vector<8x32xf32>
    %33 = vector.extract_strided_slice %10 {offsets = [0, 0], sizes = [8, 32], strides = [1, 1]} : vector<16x32xf32> to vector<8x32xf32>
    %34 = vector.extract_strided_slice %15 {offsets = [0, 0], sizes = [8, 32], strides = [1, 1]} : vector<16x32xf32> to vector<8x32xf32>
    %35 = vector.extract_strided_slice %31 {offsets = [0, 0], sizes = [8, 4], strides = [1, 1]} : vector<16x4xf32> to vector<8x4xf32>
    %cst_23 = arith.constant 0.000000e+00 : f32
    %36 = vector.broadcast %cst_23 : f32 to vector<8x32xf32>
    %c0_24 = arith.constant 0 : index
    %c0_25 = arith.constant 0 : index
    %37 = vector.load %arg9[%c0_24, %c0_25] : memref<1x32xf32, #tpu.memory_space<vmem>>, vector<1x32xf32>
    %38 = vector.broadcast %37 : vector<1x32xf32> to vector<8x32xf32>
    %39 = arith.addf %36, %38 : vector<8x32xf32>
    %40 = vector.extract_strided_slice %32 {offsets = [0, 0], sizes = [8, 8], strides = [1, 1]} : vector<8x32xf32> to vector<8x8xf32>
    %41 = vector.extract_strided_slice %33 {offsets = [0, 0], sizes = [8, 8], strides = [1, 1]} : vector<8x32xf32> to vector<8x8xf32>
    %42 = vector.extract_strided_slice %34 {offsets = [0, 0], sizes = [8, 8], strides = [1, 1]} : vector<8x32xf32> to vector<8x8xf32>
    %cst_26 = arith.constant dense<0.000000e+00> : vector<8x8xf32>
    %43 = tpu.matmul %40, %41, %cst_26 {dimension_numbers = #tpu.dot_dimension_numbers<[1], [1], [0], [0], [0, 0, 1, 0], [], []>} : vector<8x8xf32>, vector<8x8xf32>, vector<8x8xf32> -> vector<8x8xf32>
    %cst_27 = arith.constant 0.353553385 : f32
    %44 = vector.broadcast %cst_27 : f32 to vector<8x8xf32>
    %45 = arith.mulf %43, %44 : vector<8x8xf32>
    %cst_28 = arith.constant dense<0xFF800000> : vector<8xf32>
    %46 = vector.multi_reduction <maximumf>, %45, %cst_28 [1] : vector<8x8xf32> to vector<8xf32>
    %47 = vector.shape_cast %46 : vector<8xf32> to vector<8x1xf32>
    %48 = vector.broadcast %47 : vector<8x1xf32> to vector<8x8xf32>
    %49 = arith.subf %45, %48 : vector<8x8xf32>
    %50 = math.exp %49 : vector<8x8xf32>
    %cst_29 = arith.constant dense<0.000000e+00> : vector<8xf32>
    %51 = vector.multi_reduction <add>, %50, %cst_29 [1] : vector<8x8xf32> to vector<8xf32>
    %52 = vector.shape_cast %51 : vector<8xf32> to vector<8x1xf32>
    %cst_30 = arith.constant 1.000000e+00 : f32
    %53 = vector.broadcast %cst_30 : f32 to vector<8x1xf32>
    %54 = arith.divf %53, %52 : vector<8x1xf32>
    %55 = vector.broadcast %54 : vector<8x1xf32> to vector<8x8xf32>
    %56 = arith.mulf %50, %55 : vector<8x8xf32>
    %c0_31 = arith.constant 0 : index
    %c0_32 = arith.constant 0 : index
    %c0_33 = arith.constant 0 : index
    %c0_34 = arith.constant 0 : index
    %57 = vector.load %arg22[%c0_31, %c0_32, %c0_33, %c0_34] : memref<2x4x8x8xf32, #tpu.memory_space<vmem>>, vector<1x1x8x8xf32>
    %58 = vector.shape_cast %57 : vector<1x1x8x8xf32> to vector<8x8xf32>
    %59 = vector.shape_cast %56 : vector<8x8xf32> to vector<1x1x8x8xf32>
    tpu.vector_store %arg22[%c0_31, %c0_32, %c0_33, %c0_34], %59 {strides = array<i32>} : memref<2x4x8x8xf32, #tpu.memory_space<vmem>>, vector<1x1x8x8xf32>,
    %cst_35 = arith.constant dense<0.000000e+00> : vector<8x8xf32>
    %60 = tpu.matmul %56, %42, %cst_35 {dimension_numbers = #tpu.dot_dimension_numbers<[1], [0], [0], [1], [0, 0, 1, 1], [], []>} : vector<8x8xf32>, vector<8x8xf32>, vector<8x8xf32> -> vector<8x8xf32>
    %61 = vector.extract_strided_slice %35 {offsets = [0, 0], sizes = [8, 1], strides = [1, 1]} : vector<8x4xf32> to vector<8x1xf32>
    %62 = vector.broadcast %61 : vector<8x1xf32> to vector<8x8xf32>
    %63 = arith.mulf %60, %62 : vector<8x8xf32>
    %c0_36 = arith.constant 0 : index
    %c0_37 = arith.constant 0 : index
    %64 = vector.load %arg8[%c0_36, %c0_37] : memref<32x32xf32, #tpu.memory_space<vmem>>, vector<8x32xf32>
    %cst_38 = arith.constant dense<0.000000e+00> : vector<8x32xf32>
    %65 = tpu.matmul %63, %64, %cst_38 {dimension_numbers = #tpu.dot_dimension_numbers<[1], [0], [0], [1], [0, 0, 1, 1], [], []>} : vector<8x8xf32>, vector<8x32xf32>, vector<8x32xf32> -> vector<8x32xf32>
    %66 = arith.addf %39, %65 : vector<8x32xf32>
    %67 = vector.extract_strided_slice %32 {offsets = [0, 8], sizes = [8, 8], strides = [1, 1]} : vector<8x32xf32> to vector<8x8xf32>
    %68 = vector.extract_strided_slice %33 {offsets = [0, 8], sizes = [8, 8], strides = [1, 1]} : vector<8x32xf32> to vector<8x8xf32>
    %69 = vector.extract_strided_slice %34 {offsets = [0, 8], sizes = [8, 8], strides = [1, 1]} : vector<8x32xf32> to vector<8x8xf32>
    %cst_39 = arith.constant dense<0.000000e+00> : vector<8x8xf32>
    %70 = tpu.matmul %67, %68, %cst_39 {dimension_numbers = #tpu.dot_dimension_numbers<[1], [1], [0], [0], [0, 0, 1, 0], [], []>} : vector<8x8xf32>, vector<8x8xf32>, vector<8x8xf32> -> vector<8x8xf32>
    %cst_40 = arith.constant 0.353553385 : f32
    %71 = vector.broadcast %cst_40 : f32 to vector<8x8xf32>
    %72 = arith.mulf %70, %71 : vector<8x8xf32>
    %cst_41 = arith.constant dense<0xFF800000> : vector<8xf32>
    %73 = vector.multi_reduction <maximumf>, %72, %cst_41 [1] : vector<8x8xf32> to vector<8xf32>
    %74 = vector.shape_cast %73 : vector<8xf32> to vector<8x1xf32>
    %75 = vector.broadcast %74 : vector<8x1xf32> to vector<8x8xf32>
    %76 = arith.subf %72, %75 : vector<8x8xf32>
    %77 = math.exp %76 : vector<8x8xf32>
    %cst_42 = arith.constant dense<0.000000e+00> : vector<8xf32>
    %78 = vector.multi_reduction <add>, %77, %cst_42 [1] : vector<8x8xf32> to vector<8xf32>
    %79 = vector.shape_cast %78 : vector<8xf32> to vector<8x1xf32>
    %cst_43 = arith.constant 1.000000e+00 : f32
    %80 = vector.broadcast %cst_43 : f32 to vector<8x1xf32>
    %81 = arith.divf %80, %79 : vector<8x1xf32>
    %82 = vector.broadcast %81 : vector<8x1xf32> to vector<8x8xf32>
    %83 = arith.mulf %77, %82 : vector<8x8xf32>
    %c0_44 = arith.constant 0 : index
    %c1 = arith.constant 1 : index
    %c0_45 = arith.constant 0 : index
    %c0_46 = arith.constant 0 : index
    %84 = vector.load %arg22[%c0_44, %c1, %c0_45, %c0_46] : memref<2x4x8x8xf32, #tpu.memory_space<vmem>>, vector<1x1x8x8xf32>
    %85 = vector.shape_cast %84 : vector<1x1x8x8xf32> to vector<8x8xf32>
    %86 = vector.shape_cast %83 : vector<8x8xf32> to vector<1x1x8x8xf32>
    tpu.vector_store %arg22[%c0_44, %c1, %c0_45, %c0_46], %86 {strides = array<i32>} : memref<2x4x8x8xf32, #tpu.memory_space<vmem>>, vector<1x1x8x8xf32>,
    %cst_47 = arith.constant dense<0.000000e+00> : vector<8x8xf32>
    %87 = tpu.matmul %83, %69, %cst_47 {dimension_numbers = #tpu.dot_dimension_numbers<[1], [0], [0], [1], [0, 0, 1, 1], [], []>} : vector<8x8xf32>, vector<8x8xf32>, vector<8x8xf32> -> vector<8x8xf32>
    %88 = vector.extract_strided_slice %35 {offsets = [0, 1], sizes = [8, 1], strides = [1, 1]} : vector<8x4xf32> to vector<8x1xf32>
    %89 = vector.broadcast %88 : vector<8x1xf32> to vector<8x8xf32>
    %90 = arith.mulf %87, %89 : vector<8x8xf32>
    %c8 = arith.constant 8 : index
    %c0_48 = arith.constant 0 : index
    %91 = vector.load %arg8[%c8, %c0_48] : memref<32x32xf32, #tpu.memory_space<vmem>>, vector<8x32xf32>
    %cst_49 = arith.constant dense<0.000000e+00> : vector<8x32xf32>
    %92 = tpu.matmul %90, %91, %cst_49 {dimension_numbers = #tpu.dot_dimension_numbers<[1], [0], [0], [1], [0, 0, 1, 1], [], []>} : vector<8x8xf32>, vector<8x32xf32>, vector<8x32xf32> -> vector<8x32xf32>
    %93 = arith.addf %66, %92 : vector<8x32xf32>
    %94 = vector.extract_strided_slice %32 {offsets = [0, 16], sizes = [8, 8], strides = [1, 1]} : vector<8x32xf32> to vector<8x8xf32>
    %95 = vector.extract_strided_slice %33 {offsets = [0, 16], sizes = [8, 8], strides = [1, 1]} : vector<8x32xf32> to vector<8x8xf32>
    %96 = vector.extract_strided_slice %34 {offsets = [0, 16], sizes = [8, 8], strides = [1, 1]} : vector<8x32xf32> to vector<8x8xf32>
    %cst_50 = arith.constant dense<0.000000e+00> : vector<8x8xf32>
    %97 = tpu.matmul %94, %95, %cst_50 {dimension_numbers = #tpu.dot_dimension_numbers<[1], [1], [0], [0], [0, 0, 1, 0], [], []>} : vector<8x8xf32>, vector<8x8xf32>, vector<8x8xf32> -> vector<8x8xf32>
    %cst_51 = arith.constant 0.353553385 : f32
    %98 = vector.broadcast %cst_51 : f32 to vector<8x8xf32>
    %99 = arith.mulf %97, %98 : vector<8x8xf32>
    %cst_52 = arith.constant dense<0xFF800000> : vector<8xf32>
    %100 = vector.multi_reduction <maximumf>, %99, %cst_52 [1] : vector<8x8xf32> to vector<8xf32>
    %101 = vector.shape_cast %100 : vector<8xf32> to vector<8x1xf32>
    %102 = vector.broadcast %101 : vector<8x1xf32> to vector<8x8xf32>
    %103 = arith.subf %99, %102 : vector<8x8xf32>
    %104 = math.exp %103 : vector<8x8xf32>
    %cst_53 = arith.constant dense<0.000000e+00> : vector<8xf32>
    %105 = vector.multi_reduction <add>, %104, %cst_53 [1] : vector<8x8xf32> to vector<8xf32>
    %106 = vector.shape_cast %105 : vector<8xf32> to vector<8x1xf32>
    %cst_54 = arith.constant 1.000000e+00 : f32
    %107 = vector.broadcast %cst_54 : f32 to vector<8x1xf32>
    %108 = arith.divf %107, %106 : vector<8x1xf32>
    %109 = vector.broadcast %108 : vector<8x1xf32> to vector<8x8xf32>
    %110 = arith.mulf %104, %109 : vector<8x8xf32>
    %c0_55 = arith.constant 0 : index
    %c2 = arith.constant 2 : index
    %c0_56 = arith.constant 0 : index
    %c0_57 = arith.constant 0 : index
    %111 = vector.load %arg22[%c0_55, %c2, %c0_56, %c0_57] : memref<2x4x8x8xf32, #tpu.memory_space<vmem>>, vector<1x1x8x8xf32>
    %112 = vector.shape_cast %111 : vector<1x1x8x8xf32> to vector<8x8xf32>
    %113 = vector.shape_cast %110 : vector<8x8xf32> to vector<1x1x8x8xf32>
    tpu.vector_store %arg22[%c0_55, %c2, %c0_56, %c0_57], %113 {strides = array<i32>} : memref<2x4x8x8xf32, #tpu.memory_space<vmem>>, vector<1x1x8x8xf32>,
    %cst_58 = arith.constant dense<0.000000e+00> : vector<8x8xf32>
    %114 = tpu.matmul %110, %96, %cst_58 {dimension_numbers = #tpu.dot_dimension_numbers<[1], [0], [0], [1], [0, 0, 1, 1], [], []>} : vector<8x8xf32>, vector<8x8xf32>, vector<8x8xf32> -> vector<8x8xf32>
    %115 = vector.extract_strided_slice %35 {offsets = [0, 2], sizes = [8, 1], strides = [1, 1]} : vector<8x4xf32> to vector<8x1xf32>
    %116 = vector.broadcast %115 : vector<8x1xf32> to vector<8x8xf32>
    %117 = arith.mulf %114, %116 : vector<8x8xf32>
    %c16 = arith.constant 16 : index
    %c0_59 = arith.constant 0 : index
    %118 = vector.load %arg8[%c16, %c0_59] : memref<32x32xf32, #tpu.memory_space<vmem>>, vector<8x32xf32>
    %cst_60 = arith.constant dense<0.000000e+00> : vector<8x32xf32>
    %119 = tpu.matmul %117, %118, %cst_60 {dimension_numbers = #tpu.dot_dimension_numbers<[1], [0], [0], [1], [0, 0, 1, 1], [], []>} : vector<8x8xf32>, vector<8x32xf32>, vector<8x32xf32> -> vector<8x32xf32>
    %120 = arith.addf %93, %119 : vector<8x32xf32>
    %121 = vector.extract_strided_slice %32 {offsets = [0, 24], sizes = [8, 8], strides = [1, 1]} : vector<8x32xf32> to vector<8x8xf32>
    %122 = vector.extract_strided_slice %33 {offsets = [0, 24], sizes = [8, 8], strides = [1, 1]} : vector<8x32xf32> to vector<8x8xf32>
    %123 = vector.extract_strided_slice %34 {offsets = [0, 24], sizes = [8, 8], strides = [1, 1]} : vector<8x32xf32> to vector<8x8xf32>
    %cst_61 = arith.constant dense<0.000000e+00> : vector<8x8xf32>
    %124 = tpu.matmul %121, %122, %cst_61 {dimension_numbers = #tpu.dot_dimension_numbers<[1], [1], [0], [0], [0, 0, 1, 0], [], []>} : vector<8x8xf32>, vector<8x8xf32>, vector<8x8xf32> -> vector<8x8xf32>
    %cst_62 = arith.constant 0.353553385 : f32
    %125 = vector.broadcast %cst_62 : f32 to vector<8x8xf32>
    %126 = arith.mulf %124, %125 : vector<8x8xf32>
    %cst_63 = arith.constant dense<0xFF800000> : vector<8xf32>
    %127 = vector.multi_reduction <maximumf>, %126, %cst_63 [1] : vector<8x8xf32> to vector<8xf32>
    %128 = vector.shape_cast %127 : vector<8xf32> to vector<8x1xf32>
    %129 = vector.broadcast %128 : vector<8x1xf32> to vector<8x8xf32>
    %130 = arith.subf %126, %129 : vector<8x8xf32>
    %131 = math.exp %130 : vector<8x8xf32>
    %cst_64 = arith.constant dense<0.000000e+00> : vector<8xf32>
    %132 = vector.multi_reduction <add>, %131, %cst_64 [1] : vector<8x8xf32> to vector<8xf32>
    %133 = vector.shape_cast %132 : vector<8xf32> to vector<8x1xf32>
    %cst_65 = arith.constant 1.000000e+00 : f32
    %134 = vector.broadcast %cst_65 : f32 to vector<8x1xf32>
    %135 = arith.divf %134, %133 : vector<8x1xf32>
    %136 = vector.broadcast %135 : vector<8x1xf32> to vector<8x8xf32>
    %137 = arith.mulf %131, %136 : vector<8x8xf32>
    %c0_66 = arith.constant 0 : index
    %c3 = arith.constant 3 : index
    %c0_67 = arith.constant 0 : index
    %c0_68 = arith.constant 0 : index
    %138 = vector.load %arg22[%c0_66, %c3, %c0_67, %c0_68] : memref<2x4x8x8xf32, #tpu.memory_space<vmem>>, vector<1x1x8x8xf32>
    %139 = vector.shape_cast %138 : vector<1x1x8x8xf32> to vector<8x8xf32>
    %140 = vector.shape_cast %137 : vector<8x8xf32> to vector<1x1x8x8xf32>
    tpu.vector_store %arg22[%c0_66, %c3, %c0_67, %c0_68], %140 {strides = array<i32>} : memref<2x4x8x8xf32, #tpu.memory_space<vmem>>, vector<1x1x8x8xf32>,
    %cst_69 = arith.constant dense<0.000000e+00> : vector<8x8xf32>
    %141 = tpu.matmul %137, %123, %cst_69 {dimension_numbers = #tpu.dot_dimension_numbers<[1], [0], [0], [1], [0, 0, 1, 1], [], []>} : vector<8x8xf32>, vector<8x8xf32>, vector<8x8xf32> -> vector<8x8xf32>
    %142 = vector.extract_strided_slice %35 {offsets = [0, 3], sizes = [8, 1], strides = [1, 1]} : vector<8x4xf32> to vector<8x1xf32>
    %143 = vector.broadcast %142 : vector<8x1xf32> to vector<8x8xf32>
    %144 = arith.mulf %141, %143 : vector<8x8xf32>
    %c24 = arith.constant 24 : index
    %c0_70 = arith.constant 0 : index
    %145 = vector.load %arg8[%c24, %c0_70] : memref<32x32xf32, #tpu.memory_space<vmem>>, vector<8x32xf32>
    %cst_71 = arith.constant dense<0.000000e+00> : vector<8x32xf32>
    %146 = tpu.matmul %144, %145, %cst_71 {dimension_numbers = #tpu.dot_dimension_numbers<[1], [0], [0], [1], [0, 0, 1, 1], [], []>} : vector<8x8xf32>, vector<8x32xf32>, vector<8x32xf32> -> vector<8x32xf32>
    %147 = arith.addf %120, %146 : vector<8x32xf32>
    %c0_72 = arith.constant 0 : index
    %c0_73 = arith.constant 0 : index
    %148 = vector.load %arg23[%c0_72, %c0_73] : memref<16x32xf32, #tpu.memory_space<vmem>>, vector<8x32xf32>
    tpu.vector_store %arg23[%c0_72, %c0_73], %147 {strides = array<i32>} : memref<16x32xf32, #tpu.memory_space<vmem>>, vector<8x32xf32>,
    %149 = vector.extract_strided_slice %5 {offsets = [8, 0], sizes = [8, 32], strides = [1, 1]} : vector<16x32xf32> to vector<8x32xf32>
    %150 = vector.extract_strided_slice %10 {offsets = [8, 0], sizes = [8, 32], strides = [1, 1]} : vector<16x32xf32> to vector<8x32xf32>
    %151 = vector.extract_strided_slice %15 {offsets = [8, 0], sizes = [8, 32], strides = [1, 1]} : vector<16x32xf32> to vector<8x32xf32>
    %152 = vector.extract_strided_slice %31 {offsets = [8, 0], sizes = [8, 4], strides = [1, 1]} : vector<16x4xf32> to vector<8x4xf32>
    %cst_74 = arith.constant 0.000000e+00 : f32
    %153 = vector.broadcast %cst_74 : f32 to vector<8x32xf32>
    %c0_75 = arith.constant 0 : index
    %c0_76 = arith.constant 0 : index
    %154 = vector.load %arg9[%c0_75, %c0_76] : memref<1x32xf32, #tpu.memory_space<vmem>>, vector<1x32xf32>
    %155 = vector.broadcast %154 : vector<1x32xf32> to vector<8x32xf32>
    %156 = arith.addf %153, %155 : vector<8x32xf32>
    %157 = vector.extract_strided_slice %149 {offsets = [0, 0], sizes = [8, 8], strides = [1, 1]} : vector<8x32xf32> to vector<8x8xf32>
    %158 = vector.extract_strided_slice %150 {offsets = [0, 0], sizes = [8, 8], strides = [1, 1]} : vector<8x32xf32> to vector<8x8xf32>
    %159 = vector.extract_strided_slice %151 {offsets = [0, 0], sizes = [8, 8], strides = [1, 1]} : vector<8x32xf32> to vector<8x8xf32>
    %cst_77 = arith.constant dense<0.000000e+00> : vector<8x8xf32>
    %160 = tpu.matmul %157, %158, %cst_77 {dimension_numbers = #tpu.dot_dimension_numbers<[1], [1], [0], [0], [0, 0, 1, 0], [], []>} : vector<8x8xf32>, vector<8x8xf32>, vector<8x8xf32> -> vector<8x8xf32>
    %cst_78 = arith.constant 0.353553385 : f32
    %161 = vector.broadcast %cst_78 : f32 to vector<8x8xf32>
    %162 = arith.mulf %160, %161 : vector<8x8xf32>
    %cst_79 = arith.constant dense<0xFF800000> : vector<8xf32>
    %163 = vector.multi_reduction <maximumf>, %162, %cst_79 [1] : vector<8x8xf32> to vector<8xf32>
    %164 = vector.shape_cast %163 : vector<8xf32> to vector<8x1xf32>
    %165 = vector.broadcast %164 : vector<8x1xf32> to vector<8x8xf32>
    %166 = arith.subf %162, %165 : vector<8x8xf32>
    %167 = math.exp %166 : vector<8x8xf32>
    %cst_80 = arith.constant dense<0.000000e+00> : vector<8xf32>
    %168 = vector.multi_reduction <add>, %167, %cst_80 [1] : vector<8x8xf32> to vector<8xf32>
    %169 = vector.shape_cast %168 : vector<8xf32> to vector<8x1xf32>
    %cst_81 = arith.constant 1.000000e+00 : f32
    %170 = vector.broadcast %cst_81 : f32 to vector<8x1xf32>
    %171 = arith.divf %170, %169 : vector<8x1xf32>
    %172 = vector.broadcast %171 : vector<8x1xf32> to vector<8x8xf32>
    %173 = arith.mulf %167, %172 : vector<8x8xf32>
    %c1_82 = arith.constant 1 : index
    %c0_83 = arith.constant 0 : index
    %c0_84 = arith.constant 0 : index
    %c0_85 = arith.constant 0 : index
    %174 = vector.load %arg22[%c1_82, %c0_83, %c0_84, %c0_85] : memref<2x4x8x8xf32, #tpu.memory_space<vmem>>, vector<1x1x8x8xf32>
    %175 = vector.shape_cast %174 : vector<1x1x8x8xf32> to vector<8x8xf32>
    %176 = vector.shape_cast %173 : vector<8x8xf32> to vector<1x1x8x8xf32>
    tpu.vector_store %arg22[%c1_82, %c0_83, %c0_84, %c0_85], %176 {strides = array<i32>} : memref<2x4x8x8xf32, #tpu.memory_space<vmem>>, vector<1x1x8x8xf32>,
    %cst_86 = arith.constant dense<0.000000e+00> : vector<8x8xf32>
    %177 = tpu.matmul %173, %159, %cst_86 {dimension_numbers = #tpu.dot_dimension_numbers<[1], [0], [0], [1], [0, 0, 1, 1], [], []>} : vector<8x8xf32>, vector<8x8xf32>, vector<8x8xf32> -> vector<8x8xf32>
    %178 = vector.extract_strided_slice %152 {offsets = [0, 0], sizes = [8, 1], strides = [1, 1]} : vector<8x4xf32> to vector<8x1xf32>
    %179 = vector.broadcast %178 : vector<8x1xf32> to vector<8x8xf32>
    %180 = arith.mulf %177, %179 : vector<8x8xf32>
    %c0_87 = arith.constant 0 : index
    %c0_88 = arith.constant 0 : index
    %181 = vector.load %arg8[%c0_87, %c0_88] : memref<32x32xf32, #tpu.memory_space<vmem>>, vector<8x32xf32>
    %cst_89 = arith.constant dense<0.000000e+00> : vector<8x32xf32>
    %182 = tpu.matmul %180, %181, %cst_89 {dimension_numbers = #tpu.dot_dimension_numbers<[1], [0], [0], [1], [0, 0, 1, 1], [], []>} : vector<8x8xf32>, vector<8x32xf32>, vector<8x32xf32> -> vector<8x32xf32>
    %183 = arith.addf %156, %182 : vector<8x32xf32>
    %184 = vector.extract_strided_slice %149 {offsets = [0, 8], sizes = [8, 8], strides = [1, 1]} : vector<8x32xf32> to vector<8x8xf32>
    %185 = vector.extract_strided_slice %150 {offsets = [0, 8], sizes = [8, 8], strides = [1, 1]} : vector<8x32xf32> to vector<8x8xf32>
    %186 = vector.extract_strided_slice %151 {offsets = [0, 8], sizes = [8, 8], strides = [1, 1]} : vector<8x32xf32> to vector<8x8xf32>
    %cst_90 = arith.constant dense<0.000000e+00> : vector<8x8xf32>
    %187 = tpu.matmul %184, %185, %cst_90 {dimension_numbers = #tpu.dot_dimension_numbers<[1], [1], [0], [0], [0, 0, 1, 0], [], []>} : vector<8x8xf32>, vector<8x8xf32>, vector<8x8xf32> -> vector<8x8xf32>
    %cst_91 = arith.constant 0.353553385 : f32
    %188 = vector.broadcast %cst_91 : f32 to vector<8x8xf32>
    %189 = arith.mulf %187, %188 : vector<8x8xf32>
    %cst_92 = arith.constant dense<0xFF800000> : vector<8xf32>
    %190 = vector.multi_reduction <maximumf>, %189, %cst_92 [1] : vector<8x8xf32> to vector<8xf32>
    %191 = vector.shape_cast %190 : vector<8xf32> to vector<8x1xf32>
    %192 = vector.broadcast %191 : vector<8x1xf32> to vector<8x8xf32>
    %193 = arith.subf %189, %192 : vector<8x8xf32>
    %194 = math.exp %193 : vector<8x8xf32>
    %cst_93 = arith.constant dense<0.000000e+00> : vector<8xf32>
    %195 = vector.multi_reduction <add>, %194, %cst_93 [1] : vector<8x8xf32> to vector<8xf32>
    %196 = vector.shape_cast %195 : vector<8xf32> to vector<8x1xf32>
    %cst_94 = arith.constant 1.000000e+00 : f32
    %197 = vector.broadcast %cst_94 : f32 to vector<8x1xf32>
    %198 = arith.divf %197, %196 : vector<8x1xf32>
    %199 = vector.broadcast %198 : vector<8x1xf32> to vector<8x8xf32>
    %200 = arith.mulf %194, %199 : vector<8x8xf32>
    %c1_95 = arith.constant 1 : index
    %c1_96 = arith.constant 1 : index
    %c0_97 = arith.constant 0 : index
    %c0_98 = arith.constant 0 : index
    %201 = vector.load %arg22[%c1_95, %c1_96, %c0_97, %c0_98] : memref<2x4x8x8xf32, #tpu.memory_space<vmem>>, vector<1x1x8x8xf32>
    %202 = vector.shape_cast %201 : vector<1x1x8x8xf32> to vector<8x8xf32>
    %203 = vector.shape_cast %200 : vector<8x8xf32> to vector<1x1x8x8xf32>
    tpu.vector_store %arg22[%c1_95, %c1_96, %c0_97, %c0_98], %203 {strides = array<i32>} : memref<2x4x8x8xf32, #tpu.memory_space<vmem>>, vector<1x1x8x8xf32>,
    %cst_99 = arith.constant dense<0.000000e+00> : vector<8x8xf32>
    %204 = tpu.matmul %200, %186, %cst_99 {dimension_numbers = #tpu.dot_dimension_numbers<[1], [0], [0], [1], [0, 0, 1, 1], [], []>} : vector<8x8xf32>, vector<8x8xf32>, vector<8x8xf32> -> vector<8x8xf32>
    %205 = vector.extract_strided_slice %152 {offsets = [0, 1], sizes = [8, 1], strides = [1, 1]} : vector<8x4xf32> to vector<8x1xf32>
    %206 = vector.broadcast %205 : vector<8x1xf32> to vector<8x8xf32>
    %207 = arith.mulf %204, %206 : vector<8x8xf32>
    %c8_100 = arith.constant 8 : index
    %c0_101 = arith.constant 0 : index
    %208 = vector.load %arg8[%c8_100, %c0_101] : memref<32x32xf32, #tpu.memory_space<vmem>>, vector<8x32xf32>
    %cst_102 = arith.constant dense<0.000000e+00> : vector<8x32xf32>
    %209 = tpu.matmul %207, %208, %cst_102 {dimension_numbers = #tpu.dot_dimension_numbers<[1], [0], [0], [1], [0, 0, 1, 1], [], []>} : vector<8x8xf32>, vector<8x32xf32>, vector<8x32xf32> -> vector<8x32xf32>
    %210 = arith.addf %183, %209 : vector<8x32xf32>
    %211 = vector.extract_strided_slice %149 {offsets = [0, 16], sizes = [8, 8], strides = [1, 1]} : vector<8x32xf32> to vector<8x8xf32>
    %212 = vector.extract_strided_slice %150 {offsets = [0, 16], sizes = [8, 8], strides = [1, 1]} : vector<8x32xf32> to vector<8x8xf32>
    %213 = vector.extract_strided_slice %151 {offsets = [0, 16], sizes = [8, 8], strides = [1, 1]} : vector<8x32xf32> to vector<8x8xf32>
    %cst_103 = arith.constant dense<0.000000e+00> : vector<8x8xf32>
    %214 = tpu.matmul %211, %212, %cst_103 {dimension_numbers = #tpu.dot_dimension_numbers<[1], [1], [0], [0], [0, 0, 1, 0], [], []>} : vector<8x8xf32>, vector<8x8xf32>, vector<8x8xf32> -> vector<8x8xf32>
    %cst_104 = arith.constant 0.353553385 : f32
    %215 = vector.broadcast %cst_104 : f32 to vector<8x8xf32>
    %216 = arith.mulf %214, %215 : vector<8x8xf32>
    %cst_105 = arith.constant dense<0xFF800000> : vector<8xf32>
    %217 = vector.multi_reduction <maximumf>, %216, %cst_105 [1] : vector<8x8xf32> to vector<8xf32>
    %218 = vector.shape_cast %217 : vector<8xf32> to vector<8x1xf32>
    %219 = vector.broadcast %218 : vector<8x1xf32> to vector<8x8xf32>
    %220 = arith.subf %216, %219 : vector<8x8xf32>
    %221 = math.exp %220 : vector<8x8xf32>
    %cst_106 = arith.constant dense<0.000000e+00> : vector<8xf32>
    %222 = vector.multi_reduction <add>, %221, %cst_106 [1] : vector<8x8xf32> to vector<8xf32>
    %223 = vector.shape_cast %222 : vector<8xf32> to vector<8x1xf32>
    %cst_107 = arith.constant 1.000000e+00 : f32
    %224 = vector.broadcast %cst_107 : f32 to vector<8x1xf32>
    %225 = arith.divf %224, %223 : vector<8x1xf32>
    %226 = vector.broadcast %225 : vector<8x1xf32> to vector<8x8xf32>
    %227 = arith.mulf %221, %226 : vector<8x8xf32>
    %c1_108 = arith.constant 1 : index
    %c2_109 = arith.constant 2 : index
    %c0_110 = arith.constant 0 : index
    %c0_111 = arith.constant 0 : index
    %228 = vector.load %arg22[%c1_108, %c2_109, %c0_110, %c0_111] : memref<2x4x8x8xf32, #tpu.memory_space<vmem>>, vector<1x1x8x8xf32>
    %229 = vector.shape_cast %228 : vector<1x1x8x8xf32> to vector<8x8xf32>
    %230 = vector.shape_cast %227 : vector<8x8xf32> to vector<1x1x8x8xf32>
    tpu.vector_store %arg22[%c1_108, %c2_109, %c0_110, %c0_111], %230 {strides = array<i32>} : memref<2x4x8x8xf32, #tpu.memory_space<vmem>>, vector<1x1x8x8xf32>,
    %cst_112 = arith.constant dense<0.000000e+00> : vector<8x8xf32>
    %231 = tpu.matmul %227, %213, %cst_112 {dimension_numbers = #tpu.dot_dimension_numbers<[1], [0], [0], [1], [0, 0, 1, 1], [], []>} : vector<8x8xf32>, vector<8x8xf32>, vector<8x8xf32> -> vector<8x8xf32>
    %232 = vector.extract_strided_slice %152 {offsets = [0, 2], sizes = [8, 1], strides = [1, 1]} : vector<8x4xf32> to vector<8x1xf32>
    %233 = vector.broadcast %232 : vector<8x1xf32> to vector<8x8xf32>
    %234 = arith.mulf %231, %233 : vector<8x8xf32>
    %c16_113 = arith.constant 16 : index
    %c0_114 = arith.constant 0 : index
    %235 = vector.load %arg8[%c16_113, %c0_114] : memref<32x32xf32, #tpu.memory_space<vmem>>, vector<8x32xf32>
    %cst_115 = arith.constant dense<0.000000e+00> : vector<8x32xf32>
    %236 = tpu.matmul %234, %235, %cst_115 {dimension_numbers = #tpu.dot_dimension_numbers<[1], [0], [0], [1], [0, 0, 1, 1], [], []>} : vector<8x8xf32>, vector<8x32xf32>, vector<8x32xf32> -> vector<8x32xf32>
    %237 = arith.addf %210, %236 : vector<8x32xf32>
    %238 = vector.extract_strided_slice %149 {offsets = [0, 24], sizes = [8, 8], strides = [1, 1]} : vector<8x32xf32> to vector<8x8xf32>
    %239 = vector.extract_strided_slice %150 {offsets = [0, 24], sizes = [8, 8], strides = [1, 1]} : vector<8x32xf32> to vector<8x8xf32>
    %240 = vector.extract_strided_slice %151 {offsets = [0, 24], sizes = [8, 8], strides = [1, 1]} : vector<8x32xf32> to vector<8x8xf32>
    %cst_116 = arith.constant dense<0.000000e+00> : vector<8x8xf32>
    %241 = tpu.matmul %238, %239, %cst_116 {dimension_numbers = #tpu.dot_dimension_numbers<[1], [1], [0], [0], [0, 0, 1, 0], [], []>} : vector<8x8xf32>, vector<8x8xf32>, vector<8x8xf32> -> vector<8x8xf32>
    %cst_117 = arith.constant 0.353553385 : f32
    %242 = vector.broadcast %cst_117 : f32 to vector<8x8xf32>
    %243 = arith.mulf %241, %242 : vector<8x8xf32>
    %cst_118 = arith.constant dense<0xFF800000> : vector<8xf32>
    %244 = vector.multi_reduction <maximumf>, %243, %cst_118 [1] : vector<8x8xf32> to vector<8xf32>
    %245 = vector.shape_cast %244 : vector<8xf32> to vector<8x1xf32>
    %246 = vector.broadcast %245 : vector<8x1xf32> to vector<8x8xf32>
    %247 = arith.subf %243, %246 : vector<8x8xf32>
    %248 = math.exp %247 : vector<8x8xf32>
    %cst_119 = arith.constant dense<0.000000e+00> : vector<8xf32>
    %249 = vector.multi_reduction <add>, %248, %cst_119 [1] : vector<8x8xf32> to vector<8xf32>
    %250 = vector.shape_cast %249 : vector<8xf32> to vector<8x1xf32>
    %cst_120 = arith.constant 1.000000e+00 : f32
    %251 = vector.broadcast %cst_120 : f32 to vector<8x1xf32>
    %252 = arith.divf %251, %250 : vector<8x1xf32>
    %253 = vector.broadcast %252 : vector<8x1xf32> to vector<8x8xf32>
    %254 = arith.mulf %248, %253 : vector<8x8xf32>
    %c1_121 = arith.constant 1 : index
    %c3_122 = arith.constant 3 : index
    %c0_123 = arith.constant 0 : index
    %c0_124 = arith.constant 0 : index
    %255 = vector.load %arg22[%c1_121, %c3_122, %c0_123, %c0_124] : memref<2x4x8x8xf32, #tpu.memory_space<vmem>>, vector<1x1x8x8xf32>
    %256 = vector.shape_cast %255 : vector<1x1x8x8xf32> to vector<8x8xf32>
    %257 = vector.shape_cast %254 : vector<8x8xf32> to vector<1x1x8x8xf32>
    tpu.vector_store %arg22[%c1_121, %c3_122, %c0_123, %c0_124], %257 {strides = array<i32>} : memref<2x4x8x8xf32, #tpu.memory_space<vmem>>, vector<1x1x8x8xf32>,
    %cst_125 = arith.constant dense<0.000000e+00> : vector<8x8xf32>
    %258 = tpu.matmul %254, %240, %cst_125 {dimension_numbers = #tpu.dot_dimension_numbers<[1], [0], [0], [1], [0, 0, 1, 1], [], []>} : vector<8x8xf32>, vector<8x8xf32>, vector<8x8xf32> -> vector<8x8xf32>
    %259 = vector.extract_strided_slice %152 {offsets = [0, 3], sizes = [8, 1], strides = [1, 1]} : vector<8x4xf32> to vector<8x1xf32>
    %260 = vector.broadcast %259 : vector<8x1xf32> to vector<8x8xf32>
    %261 = arith.mulf %258, %260 : vector<8x8xf32>
    %c24_126 = arith.constant 24 : index
    %c0_127 = arith.constant 0 : index
    %262 = vector.load %arg8[%c24_126, %c0_127] : memref<32x32xf32, #tpu.memory_space<vmem>>, vector<8x32xf32>
    %cst_128 = arith.constant dense<0.000000e+00> : vector<8x32xf32>
    %263 = tpu.matmul %261, %262, %cst_128 {dimension_numbers = #tpu.dot_dimension_numbers<[1], [0], [0], [1], [0, 0, 1, 1], [], []>} : vector<8x8xf32>, vector<8x32xf32>, vector<8x32xf32> -> vector<8x32xf32>
    %264 = arith.addf %237, %263 : vector<8x32xf32>
    %c8_129 = arith.constant 8 : index
    %c0_130 = arith.constant 0 : index
    %265 = vector.load %arg23[%c8_129, %c0_130] : memref<16x32xf32, #tpu.memory_space<vmem>>, vector<8x32xf32>
    tpu.vector_store %arg23[%c8_129, %c0_130], %264 {strides = array<i32>} : memref<16x32xf32, #tpu.memory_space<vmem>>, vector<8x32xf32>,
    %c0_131 = arith.constant 0 : index
    %c0_132 = arith.constant 0 : index
    %266 = vector.load %arg23[%c0_131, %c0_132] : memref<16x32xf32, #tpu.memory_space<vmem>>, vector<16x32xf32>
    %c0_133 = arith.constant 0 : index
    %c0_134 = arith.constant 0 : index
    %267 = vector.load %arg12[%c0_133, %c0_134] : memref<1x32xf32, #tpu.memory_space<vmem>>, vector<1x32xf32>
    %268 = vector.broadcast %267 : vector<1x32xf32> to vector<16x32xf32>
    %269 = arith.mulf %0, %268 : vector<16x32xf32>
    %cst_135 = arith.constant dense<0.000000e+00> : vector<16xf32>
    %270 = vector.multi_reduction <add>, %269, %cst_135 [1] : vector<16x32xf32> to vector<16xf32>
    %271 = vector.shape_cast %270 : vector<16xf32> to vector<16x1xf32>
    %c0_136 = arith.constant 0 : index
    %c0_137 = arith.constant 0 : index
    %272 = vector.load %arg13[%c0_136, %c0_137] : memref<1x32xf32, #tpu.memory_space<vmem>>, vector<1x32xf32>
    %273 = vector.broadcast %272 : vector<1x32xf32> to vector<16x32xf32>
    %274 = arith.mulf %266, %273 : vector<16x32xf32>
    %cst_138 = arith.constant dense<0.000000e+00> : vector<16xf32>
    %275 = vector.multi_reduction <add>, %274, %cst_138 [1] : vector<16x32xf32> to vector<16xf32>
    %276 = vector.shape_cast %275 : vector<16xf32> to vector<16x1xf32>
    %277 = arith.addf %271, %276 : vector<16x1xf32>
    %c0_139 = arith.constant 0 : index
    %c0_140 = arith.constant 0 : index
    %278 = vector.load %arg14[%c0_139, %c0_140] : memref<1x1xf32, #tpu.memory_space<vmem>>, vector<1x1xf32>
    %279 = vector.broadcast %278 : vector<1x1xf32> to vector<16x1xf32>
    %280 = arith.addf %277, %279 : vector<16x1xf32>
    %281 = arith.negf %280 : vector<16x1xf32>
    %282 = math.exp %281 : vector<16x1xf32>
    %cst_141 = arith.constant 1.000000e+00 : f32
    %283 = vector.broadcast %cst_141 : f32 to vector<16x1xf32>
    %284 = arith.addf %283, %282 : vector<16x1xf32>
    %285 = arith.divf %283, %284 : vector<16x1xf32>
    %286 = vector.broadcast %285 : vector<16x1xf32> to vector<16x32xf32>
    %287 = arith.mulf %0, %286 : vector<16x32xf32>
    %cst_142 = arith.constant 1.000000e+00 : f32
    %288 = vector.broadcast %cst_142 : f32 to vector<16x1xf32>
    %289 = arith.subf %288, %285 : vector<16x1xf32>
    %290 = vector.broadcast %289 : vector<16x1xf32> to vector<16x32xf32>
    %291 = arith.mulf %266, %290 : vector<16x32xf32>
    %292 = arith.addf %287, %291 : vector<16x32xf32>
    %c0_143 = arith.constant 0 : index
    %c0_144 = arith.constant 0 : index
    %293 = vector.load %arg15[%c0_143, %c0_144] : memref<32x32xf32, #tpu.memory_space<vmem>>, vector<32x32xf32>
    %cst_145 = arith.constant dense<0.000000e+00> : vector<16x32xf32>
    %294 = tpu.matmul %292, %293, %cst_145 {dimension_numbers = #tpu.dot_dimension_numbers<[1], [0], [0], [1], [0, 0, 1, 1], [], []>} : vector<16x32xf32>, vector<32x32xf32>, vector<16x32xf32> -> vector<16x32xf32>
    %c0_146 = arith.constant 0 : index
    %c0_147 = arith.constant 0 : index
    %295 = vector.load %arg16[%c0_146, %c0_147] : memref<1x32xf32, #tpu.memory_space<vmem>>, vector<1x32xf32>
    %296 = vector.broadcast %295 : vector<1x32xf32> to vector<16x32xf32>
    %297 = arith.addf %294, %296 : vector<16x32xf32>
    %cst_148 = arith.constant 0.000000e+00 : f32
    %298 = vector.broadcast %cst_148 : f32 to vector<16x32xf32>
    %299 = arith.maximumf %297, %298 : vector<16x32xf32>
    %c0_149 = arith.constant 0 : index
    %c0_150 = arith.constant 0 : index
    %300 = vector.load %arg17[%c0_149, %c0_150] : memref<32x32xf32, #tpu.memory_space<vmem>>, vector<32x32xf32>
    %cst_151 = arith.constant dense<0.000000e+00> : vector<16x32xf32>
    %301 = tpu.matmul %299, %300, %cst_151 {dimension_numbers = #tpu.dot_dimension_numbers<[1], [0], [0], [1], [0, 0, 1, 1], [], []>} : vector<16x32xf32>, vector<32x32xf32>, vector<16x32xf32> -> vector<16x32xf32>
    %c0_152 = arith.constant 0 : index
    %c0_153 = arith.constant 0 : index
    %302 = vector.load %arg18[%c0_152, %c0_153] : memref<1x32xf32, #tpu.memory_space<vmem>>, vector<1x32xf32>
    %303 = vector.broadcast %302 : vector<1x32xf32> to vector<16x32xf32>
    %304 = arith.addf %301, %303 : vector<16x32xf32>
    %305 = arith.addf %292, %304 : vector<16x32xf32>
    %cst_154 = arith.constant dense<0.000000e+00> : vector<16xf32>
    %306 = vector.multi_reduction <add>, %305, %cst_154 [1] : vector<16x32xf32> to vector<16xf32>
    %307 = vector.shape_cast %306 : vector<16xf32> to vector<16x1xf32>
    %cst_155 = arith.constant 3.200000e+01 : f32
    %308 = vector.broadcast %cst_155 : f32 to vector<16x1xf32>
    %309 = arith.divf %307, %308 : vector<16x1xf32>
    %310 = vector.broadcast %309 : vector<16x1xf32> to vector<16x32xf32>
    %311 = arith.subf %305, %310 : vector<16x32xf32>
    %312 = arith.mulf %311, %311 : vector<16x32xf32>
    %cst_156 = arith.constant dense<0.000000e+00> : vector<16xf32>
    %313 = vector.multi_reduction <add>, %312, %cst_156 [1] : vector<16x32xf32> to vector<16xf32>
    %314 = vector.shape_cast %313 : vector<16xf32> to vector<16x1xf32>
    %cst_157 = arith.constant 3.200000e+01 : f32
    %315 = vector.broadcast %cst_157 : f32 to vector<16x1xf32>
    %316 = arith.divf %314, %315 : vector<16x1xf32>
    %317 = vector.broadcast %309 : vector<16x1xf32> to vector<16x32xf32>
    %318 = arith.subf %305, %317 : vector<16x32xf32>
    %cst_158 = arith.constant 9.99999974E-6 : f32
    %319 = vector.broadcast %cst_158 : f32 to vector<16x1xf32>
    %320 = arith.addf %316, %319 : vector<16x1xf32>
    %321 = math.rsqrt %320 : vector<16x1xf32>
    %322 = vector.broadcast %321 : vector<16x1xf32> to vector<16x32xf32>
    %323 = arith.mulf %318, %322 : vector<16x32xf32>
    %c0_159 = arith.constant 0 : index
    %c0_160 = arith.constant 0 : index
    %324 = vector.load %arg19[%c0_159, %c0_160] : memref<1x32xf32, #tpu.memory_space<vmem>>, vector<1x32xf32>
    %325 = vector.broadcast %324 : vector<1x32xf32> to vector<16x32xf32>
    %326 = arith.mulf %323, %325 : vector<16x32xf32>
    %c0_161 = arith.constant 0 : index
    %c0_162 = arith.constant 0 : index
    %327 = vector.load %arg20[%c0_161, %c0_162] : memref<1x32xf32, #tpu.memory_space<vmem>>, vector<1x32xf32>
    %328 = vector.broadcast %327 : vector<1x32xf32> to vector<16x32xf32>
    %329 = arith.addf %326, %328 : vector<16x32xf32>
    %c0_163 = arith.constant 0 : index
    %c0_164 = arith.constant 0 : index
    %330 = vector.load %arg21[%c0_163, %c0_164] : memref<16x32xf32, #tpu.memory_space<vmem>>, vector<16x32xf32>
    tpu.vector_store %arg21[%c0_163, %c0_164], %329 {strides = array<i32>} : memref<16x32xf32, #tpu.memory_space<vmem>>, vector<16x32xf32>,
    %331 = vector.extract_strided_slice %285 {offsets = [0, 0], sizes = [8, 1], strides = [1, 1]} : vector<16x1xf32> to vector<8x1xf32>
    %c0_165 = arith.constant 0 : index
    %c0_166 = arith.constant 0 : index
    %c0_167 = arith.constant 0 : index
    %c0_168 = arith.constant 0 : index
    %332 = vector.load %arg22[%c0_165, %c0_166, %c0_167, %c0_168] : memref<2x4x8x8xf32, #tpu.memory_space<vmem>>, vector<1x1x8x8xf32>
    %333 = vector.shape_cast %332 : vector<1x1x8x8xf32> to vector<8x8xf32>
    %334 = vector.broadcast %331 : vector<8x1xf32> to vector<8x8xf32>
    %335 = arith.mulf %333, %334 : vector<8x8xf32>
    %c0_169 = arith.constant 0 : index
    %c0_170 = arith.constant 0 : index
    %c0_171 = arith.constant 0 : index
    %c0_172 = arith.constant 0 : index
    %336 = vector.load %arg22[%c0_169, %c0_170, %c0_171, %c0_172] : memref<2x4x8x8xf32, #tpu.memory_space<vmem>>, vector<1x1x8x8xf32>
    %337 = vector.shape_cast %336 : vector<1x1x8x8xf32> to vector<8x8xf32>
    %338 = vector.shape_cast %335 : vector<8x8xf32> to vector<1x1x8x8xf32>
    tpu.vector_store %arg22[%c0_169, %c0_170, %c0_171, %c0_172], %338 {strides = array<i32>} : memref<2x4x8x8xf32, #tpu.memory_space<vmem>>, vector<1x1x8x8xf32>,
    %c0_173 = arith.constant 0 : index
    %c1_174 = arith.constant 1 : index
    %c0_175 = arith.constant 0 : index
    %c0_176 = arith.constant 0 : index
    %339 = vector.load %arg22[%c0_173, %c1_174, %c0_175, %c0_176] : memref<2x4x8x8xf32, #tpu.memory_space<vmem>>, vector<1x1x8x8xf32>
    %340 = vector.shape_cast %339 : vector<1x1x8x8xf32> to vector<8x8xf32>
    %341 = vector.broadcast %331 : vector<8x1xf32> to vector<8x8xf32>
    %342 = arith.mulf %340, %341 : vector<8x8xf32>
    %c0_177 = arith.constant 0 : index
    %c1_178 = arith.constant 1 : index
    %c0_179 = arith.constant 0 : index
    %c0_180 = arith.constant 0 : index
    %343 = vector.load %arg22[%c0_177, %c1_178, %c0_179, %c0_180] : memref<2x4x8x8xf32, #tpu.memory_space<vmem>>, vector<1x1x8x8xf32>
    %344 = vector.shape_cast %343 : vector<1x1x8x8xf32> to vector<8x8xf32>
    %345 = vector.shape_cast %342 : vector<8x8xf32> to vector<1x1x8x8xf32>
    tpu.vector_store %arg22[%c0_177, %c1_178, %c0_179, %c0_180], %345 {strides = array<i32>} : memref<2x4x8x8xf32, #tpu.memory_space<vmem>>, vector<1x1x8x8xf32>,
    %c0_181 = arith.constant 0 : index
    %c2_182 = arith.constant 2 : index
    %c0_183 = arith.constant 0 : index
    %c0_184 = arith.constant 0 : index
    %346 = vector.load %arg22[%c0_181, %c2_182, %c0_183, %c0_184] : memref<2x4x8x8xf32, #tpu.memory_space<vmem>>, vector<1x1x8x8xf32>
    %347 = vector.shape_cast %346 : vector<1x1x8x8xf32> to vector<8x8xf32>
    %348 = vector.broadcast %331 : vector<8x1xf32> to vector<8x8xf32>
    %349 = arith.mulf %347, %348 : vector<8x8xf32>
    %c0_185 = arith.constant 0 : index
    %c2_186 = arith.constant 2 : index
    %c0_187 = arith.constant 0 : index
    %c0_188 = arith.constant 0 : index
    %350 = vector.load %arg22[%c0_185, %c2_186, %c0_187, %c0_188] : memref<2x4x8x8xf32, #tpu.memory_space<vmem>>, vector<1x1x8x8xf32>
    %351 = vector.shape_cast %350 : vector<1x1x8x8xf32> to vector<8x8xf32>
    %352 = vector.shape_cast %349 : vector<8x8xf32> to vector<1x1x8x8xf32>
    tpu.vector_store %arg22[%c0_185, %c2_186, %c0_187, %c0_188], %352 {strides = array<i32>} : memref<2x4x8x8xf32, #tpu.memory_space<vmem>>, vector<1x1x8x8xf32>,
    %c0_189 = arith.constant 0 : index
    %c3_190 = arith.constant 3 : index
    %c0_191 = arith.constant 0 : index
    %c0_192 = arith.constant 0 : index
    %353 = vector.load %arg22[%c0_189, %c3_190, %c0_191, %c0_192] : memref<2x4x8x8xf32, #tpu.memory_space<vmem>>, vector<1x1x8x8xf32>
    %354 = vector.shape_cast %353 : vector<1x1x8x8xf32> to vector<8x8xf32>
    %355 = vector.broadcast %331 : vector<8x1xf32> to vector<8x8xf32>
    %356 = arith.mulf %354, %355 : vector<8x8xf32>
    %c0_193 = arith.constant 0 : index
    %c3_194 = arith.constant 3 : index
    %c0_195 = arith.constant 0 : index
    %c0_196 = arith.constant 0 : index
    %357 = vector.load %arg22[%c0_193, %c3_194, %c0_195, %c0_196] : memref<2x4x8x8xf32, #tpu.memory_space<vmem>>, vector<1x1x8x8xf32>
    %358 = vector.shape_cast %357 : vector<1x1x8x8xf32> to vector<8x8xf32>
    %359 = vector.shape_cast %356 : vector<8x8xf32> to vector<1x1x8x8xf32>
    tpu.vector_store %arg22[%c0_193, %c3_194, %c0_195, %c0_196], %359 {strides = array<i32>} : memref<2x4x8x8xf32, #tpu.memory_space<vmem>>, vector<1x1x8x8xf32>,
    %360 = vector.extract_strided_slice %285 {offsets = [8, 0], sizes = [8, 1], strides = [1, 1]} : vector<16x1xf32> to vector<8x1xf32>
    %c1_197 = arith.constant 1 : index
    %c0_198 = arith.constant 0 : index
    %c0_199 = arith.constant 0 : index
    %c0_200 = arith.constant 0 : index
    %361 = vector.load %arg22[%c1_197, %c0_198, %c0_199, %c0_200] : memref<2x4x8x8xf32, #tpu.memory_space<vmem>>, vector<1x1x8x8xf32>
    %362 = vector.shape_cast %361 : vector<1x1x8x8xf32> to vector<8x8xf32>
    %363 = vector.broadcast %360 : vector<8x1xf32> to vector<8x8xf32>
    %364 = arith.mulf %362, %363 : vector<8x8xf32>
    %c1_201 = arith.constant 1 : index
    %c0_202 = arith.constant 0 : index
    %c0_203 = arith.constant 0 : index
    %c0_204 = arith.constant 0 : index
    %365 = vector.load %arg22[%c1_201, %c0_202, %c0_203, %c0_204] : memref<2x4x8x8xf32, #tpu.memory_space<vmem>>, vector<1x1x8x8xf32>
    %366 = vector.shape_cast %365 : vector<1x1x8x8xf32> to vector<8x8xf32>
    %367 = vector.shape_cast %364 : vector<8x8xf32> to vector<1x1x8x8xf32>
    tpu.vector_store %arg22[%c1_201, %c0_202, %c0_203, %c0_204], %367 {strides = array<i32>} : memref<2x4x8x8xf32, #tpu.memory_space<vmem>>, vector<1x1x8x8xf32>,
    %c1_205 = arith.constant 1 : index
    %c1_206 = arith.constant 1 : index
    %c0_207 = arith.constant 0 : index
    %c0_208 = arith.constant 0 : index
    %368 = vector.load %arg22[%c1_205, %c1_206, %c0_207, %c0_208] : memref<2x4x8x8xf32, #tpu.memory_space<vmem>>, vector<1x1x8x8xf32>
    %369 = vector.shape_cast %368 : vector<1x1x8x8xf32> to vector<8x8xf32>
    %370 = vector.broadcast %360 : vector<8x1xf32> to vector<8x8xf32>
    %371 = arith.mulf %369, %370 : vector<8x8xf32>
    %c1_209 = arith.constant 1 : index
    %c1_210 = arith.constant 1 : index
    %c0_211 = arith.constant 0 : index
    %c0_212 = arith.constant 0 : index
    %372 = vector.load %arg22[%c1_209, %c1_210, %c0_211, %c0_212] : memref<2x4x8x8xf32, #tpu.memory_space<vmem>>, vector<1x1x8x8xf32>
    %373 = vector.shape_cast %372 : vector<1x1x8x8xf32> to vector<8x8xf32>
    %374 = vector.shape_cast %371 : vector<8x8xf32> to vector<1x1x8x8xf32>
    tpu.vector_store %arg22[%c1_209, %c1_210, %c0_211, %c0_212], %374 {strides = array<i32>} : memref<2x4x8x8xf32, #tpu.memory_space<vmem>>, vector<1x1x8x8xf32>,
    %c1_213 = arith.constant 1 : index
    %c2_214 = arith.constant 2 : index
    %c0_215 = arith.constant 0 : index
    %c0_216 = arith.constant 0 : index
    %375 = vector.load %arg22[%c1_213, %c2_214, %c0_215, %c0_216] : memref<2x4x8x8xf32, #tpu.memory_space<vmem>>, vector<1x1x8x8xf32>
    %376 = vector.shape_cast %375 : vector<1x1x8x8xf32> to vector<8x8xf32>
    %377 = vector.broadcast %360 : vector<8x1xf32> to vector<8x8xf32>
    %378 = arith.mulf %376, %377 : vector<8x8xf32>
    %c1_217 = arith.constant 1 : index
    %c2_218 = arith.constant 2 : index
    %c0_219 = arith.constant 0 : index
    %c0_220 = arith.constant 0 : index
    %379 = vector.load %arg22[%c1_217, %c2_218, %c0_219, %c0_220] : memref<2x4x8x8xf32, #tpu.memory_space<vmem>>, vector<1x1x8x8xf32>
    %380 = vector.shape_cast %379 : vector<1x1x8x8xf32> to vector<8x8xf32>
    %381 = vector.shape_cast %378 : vector<8x8xf32> to vector<1x1x8x8xf32>
    tpu.vector_store %arg22[%c1_217, %c2_218, %c0_219, %c0_220], %381 {strides = array<i32>} : memref<2x4x8x8xf32, #tpu.memory_space<vmem>>, vector<1x1x8x8xf32>,
    %c1_221 = arith.constant 1 : index
    %c3_222 = arith.constant 3 : index
    %c0_223 = arith.constant 0 : index
    %c0_224 = arith.constant 0 : index
    %382 = vector.load %arg22[%c1_221, %c3_222, %c0_223, %c0_224] : memref<2x4x8x8xf32, #tpu.memory_space<vmem>>, vector<1x1x8x8xf32>
    %383 = vector.shape_cast %382 : vector<1x1x8x8xf32> to vector<8x8xf32>
    %384 = vector.broadcast %360 : vector<8x1xf32> to vector<8x8xf32>
    %385 = arith.mulf %383, %384 : vector<8x8xf32>
    %c1_225 = arith.constant 1 : index
    %c3_226 = arith.constant 3 : index
    %c0_227 = arith.constant 0 : index
    %c0_228 = arith.constant 0 : index
    %386 = vector.load %arg22[%c1_225, %c3_226, %c0_227, %c0_228] : memref<2x4x8x8xf32, #tpu.memory_space<vmem>>, vector<1x1x8x8xf32>
    %387 = vector.shape_cast %386 : vector<1x1x8x8xf32> to vector<8x8xf32>
    %388 = vector.shape_cast %385 : vector<8x8xf32> to vector<1x1x8x8xf32>
    tpu.vector_store %arg22[%c1_225, %c3_226, %c0_227, %c0_228], %388 {strides = array<i32>} : memref<2x4x8x8xf32, #tpu.memory_space<vmem>>, vector<1x1x8x8xf32>,
    return
  }
  func.func @transform_0(%arg0: i32) -> (i32, i32) {
    %c0_i32 = arith.constant 0 : i32
    %c0_i32_0 = arith.constant 0 : i32
    return %arg0, %c0_i32 : i32, i32
  }
  func.func @transform_1(%arg0: i32) -> (i32, i32) {
    %c0_i32 = arith.constant 0 : i32
    %c0_i32_0 = arith.constant 0 : i32
    %c0_i32_1 = arith.constant 0 : i32
    return %c0_i32, %c0_i32_0 : i32, i32
  }
  func.func @transform_2(%arg0: i32) -> (i32, i32) {
    %c0_i32 = arith.constant 0 : i32
    %c0_i32_0 = arith.constant 0 : i32
    %c0_i32_1 = arith.constant 0 : i32
    return %c0_i32, %c0_i32_0 : i32, i32
  }
  func.func @transform_3(%arg0: i32) -> (i32, i32) {
    %c0_i32 = arith.constant 0 : i32
    %c0_i32_0 = arith.constant 0 : i32
    %c0_i32_1 = arith.constant 0 : i32
    return %c0_i32, %c0_i32_0 : i32, i32
  }
  func.func @transform_4(%arg0: i32) -> (i32, i32) {
    %c0_i32 = arith.constant 0 : i32
    %c0_i32_0 = arith.constant 0 : i32
    %c0_i32_1 = arith.constant 0 : i32
    return %c0_i32, %c0_i32_0 : i32, i32
  }
  func.func @transform_5(%arg0: i32) -> (i32, i32) {
    %c0_i32 = arith.constant 0 : i32
    %c0_i32_0 = arith.constant 0 : i32
    %c0_i32_1 = arith.constant 0 : i32
    return %c0_i32, %c0_i32_0 : i32, i32
  }
  func.func @transform_6(%arg0: i32) -> (i32, i32) {
    %c0_i32 = arith.constant 0 : i32
    %c0_i32_0 = arith.constant 0 : i32
    %c0_i32_1 = arith.constant 0 : i32
    return %c0_i32, %c0_i32_0 : i32, i32
  }
  func.func @transform_7(%arg0: i32) -> (i32, i32) {
    %c0_i32 = arith.constant 0 : i32
    %c0_i32_0 = arith.constant 0 : i32
    %c0_i32_1 = arith.constant 0 : i32
    return %c0_i32, %c0_i32_0 : i32, i32
  }
  func.func @transform_8(%arg0: i32) -> (i32, i32) {
    %c0_i32 = arith.constant 0 : i32
    %c0_i32_0 = arith.constant 0 : i32
    %c0_i32_1 = arith.constant 0 : i32
    return %c0_i32, %c0_i32_0 : i32, i32
  }
  func.func @transform_9(%arg0: i32) -> (i32, i32) {
    %c0_i32 = arith.constant 0 : i32
    %c0_i32_0 = arith.constant 0 : i32
    %c0_i32_1 = arith.constant 0 : i32
    return %c0_i32, %c0_i32_0 : i32, i32
  }
  func.func @transform_10(%arg0: i32) -> (i32, i32) {
    %c0_i32 = arith.constant 0 : i32
    %c0_i32_0 = arith.constant 0 : i32
    %c0_i32_1 = arith.constant 0 : i32
    return %c0_i32, %c0_i32_0 : i32, i32
  }
  func.func @transform_11(%arg0: i32) -> (i32, i32) {
    %c0_i32 = arith.constant 0 : i32
    %c0_i32_0 = arith.constant 0 : i32
    %c0_i32_1 = arith.constant 0 : i32
    return %c0_i32, %c0_i32_0 : i32, i32
  }
  func.func @transform_12(%arg0: i32) -> (i32, i32) {
    %c0_i32 = arith.constant 0 : i32
    %c0_i32_0 = arith.constant 0 : i32
    %c0_i32_1 = arith.constant 0 : i32
    return %c0_i32, %c0_i32_0 : i32, i32
  }
  func.func @transform_13(%arg0: i32) -> (i32, i32) {
    %c0_i32 = arith.constant 0 : i32
    %c0_i32_0 = arith.constant 0 : i32
    %c0_i32_1 = arith.constant 0 : i32
    return %c0_i32, %c0_i32_0 : i32, i32
  }
  func.func @transform_14(%arg0: i32) -> (i32, i32) {
    %c0_i32 = arith.constant 0 : i32
    %c0_i32_0 = arith.constant 0 : i32
    %c0_i32_1 = arith.constant 0 : i32
    return %c0_i32, %c0_i32_0 : i32, i32
  }
  func.func @transform_15(%arg0: i32) -> (i32, i32) {
    %c0_i32 = arith.constant 0 : i32
    %c0_i32_0 = arith.constant 0 : i32
    %c0_i32_1 = arith.constant 0 : i32
    return %c0_i32, %c0_i32_0 : i32, i32
  }
  func.func @transform_16(%arg0: i32) -> (i32, i32) {
    %c0_i32 = arith.constant 0 : i32
    %c0_i32_0 = arith.constant 0 : i32
    %c0_i32_1 = arith.constant 0 : i32
    return %c0_i32, %c0_i32_0 : i32, i32
  }
  func.func @transform_17(%arg0: i32) -> (i32, i32) {
    %c0_i32 = arith.constant 0 : i32
    %c0_i32_0 = arith.constant 0 : i32
    %c0_i32_1 = arith.constant 0 : i32
    return %c0_i32, %c0_i32_0 : i32, i32
  }
  func.func @transform_18(%arg0: i32) -> (i32, i32) {
    %c0_i32 = arith.constant 0 : i32
    %c0_i32_0 = arith.constant 0 : i32
    %c0_i32_1 = arith.constant 0 : i32
    return %c0_i32, %c0_i32_0 : i32, i32
  }
  func.func @transform_19(%arg0: i32) -> (i32, i32) {
    %c0_i32 = arith.constant 0 : i32
    %c0_i32_0 = arith.constant 0 : i32
    %c0_i32_1 = arith.constant 0 : i32
    return %c0_i32, %c0_i32_0 : i32, i32
  }
  func.func @transform_20(%arg0: i32) -> (i32, i32) {
    %c0_i32 = arith.constant 0 : i32
    %c0_i32_0 = arith.constant 0 : i32
    return %arg0, %c0_i32 : i32, i32
  }
  func.func @transform_21(%arg0: i32) -> (i32, i32, i32, i32) {
    %c0_i32 = arith.constant 0 : i32
    %c0_i32_0 = arith.constant 0 : i32
    %c0_i32_1 = arith.constant 0 : i32
    %c0_i32_2 = arith.constant 0 : i32
    return %arg0, %c0_i32, %c0_i32_0, %c0_i32_1 : i32, i32, i32, i32
  }
}

</mosaic_0001>

<bundles_post_ra>
// kernel: tpu_custom_call.1
= control target key start
LH: loop header
LB: loop body
LE: loop exit
PB: predicated region body
PF: predicated region fallthrough
CT: control target
= control target key end

     0   :  { %s4232_s0 = inlined_call_operand.hbm [shape: f32[16,32], index: 0, kind: input, shape index: {}]   ;;  %s4233_s1 = inlined_call_operand.vmem [shape: f32[32,32], index: 1, kind: input, shape index: {}]   ;;  %s4234_s2 = inlined_call_operand.vmem [shape: f32[1,32], index: 2, kind: input, shape index: {}]   ;;  %s4235_s3 = inlined_call_operand.hbm [shape: f32[32,32], index: 3, kind: input, shape index: {}]   ;;  %s4236_s4 = inlined_call_operand.hbm [shape: f32[1,32], index: 4, kind: input, shape index: {}]   ;;  %s4237_s5 = inlined_call_operand.hbm [shape: f32[32,32], index: 5, kind: input, shape index: {}]   ;;  %s4238_s6 = inlined_call_operand.hbm [shape: f32[1,32], index: 6, kind: input, shape index: {}]   ;;  %s4239_s7 = inlined_call_operand.hbm [shape: f32[32,32], index: 7, kind: input, shape index: {}]   ;;  %s4240_s8 = inlined_call_operand.hbm [shape: f32[1,32], index: 8, kind: input, shape index: {}]   ;;  %s4241_s9 = inlined_call_operand.vmem [shape: f32[32,4], index: 9, kind: input, shape index: {}]   ;;  %s4242_s10 = inlined_call_operand.hbm [shape: f32[1,4], index: 10, kind: input, shape index: {}]   ;;  %s4243_s11 = inlined_call_operand.hbm [shape: f32[1,32], index: 11, kind: input, shape index: {}]   ;;  %s4244_s12 = inlined_call_operand.hbm [shape: f32[1,32], index: 12, kind: input, shape index: {}]   ;;  %s4245_s13 = inlined_call_operand.<no memory space> [shape: f32[1,1], index: 13, kind: input, shape index: {}]   ;;  %s4246_s14 = inlined_call_operand.hbm [shape: f32[32,32], index: 14, kind: input, shape index: {}]   ;;  %s4247_s15 = inlined_call_operand.hbm [shape: f32[1,32], index: 15, kind: input, shape index: {}]   ;;  %s4248_s16 = inlined_call_operand.vmem [shape: f32[32,32], index: 16, kind: input, shape index: {}]   ;;  %s4249_s17 = inlined_call_operand.vmem [shape: f32[1,32], index: 17, kind: input, shape index: {}]   ;;  %s4250_s18 = inlined_call_operand.vmem [shape: f32[1,32], index: 18, kind: input, shape index: {}]   ;;  %s4251_s19 = inlined_call_operand.vmem [shape: f32[1,32], index: 19, kind: input, shape index: {}]   ;;  %s4252_s20 = inlined_call_operand.hbm [shape: f32[16,32], index: 20, kind: output, shape index: {0}]   ;;  %s4253_s21 = inlined_call_operand.hbm [shape: f32[2,4,8,8], index: 21, kind: output, shape index: {1}]  }
   0x1   :  { %4255 = sst [smem:[#allocation36_spill]] %s4232_s0  ;;  %v27_v0 = vstv %s4245_s13 }
   0x2   :  { %4256 = sst [smem:[#allocation37_spill]] %s4233_s1  ;;  %28 = vst [vmem:[#allocation3] sm:$0x1] %v27_v0 }
   0x3   :  { %4257 = sst [smem:[#allocation38_spill]] %s4234_s2 }
   0x4   :  { %4258 = sst [smem:[#allocation39_spill]] %s4235_s3 }
   0x5   :  { %4259 = sst [smem:[#allocation40_spill]] %s4236_s4 }
   0x6   :  { %4260 = sst [smem:[#allocation41_spill]] %s4237_s5 }
   0x7   :  { %29 = vsyncpa [#allocation5], 0 }
   0x8   :  { %30 = vsyncpa [#allocation8], 0 }
   0x9   :  { %31 = vsyncpa [#allocation11], 0 }
   0xa   :  { %32 = vsyncpa [#allocation14], 0 }
   0xb   :  { %33 = vsyncpa [#allocation17], 0 }
   0xc   :  { %34 = vsyncpa [#allocation20], 0 }
   0xd   :  { %35 = vsyncpa [#allocation23], 0 }
   0xe   :  { %36 = vsyncpa [#allocation6], 0 }
   0xf   :  { %37 = vsyncpa [#allocation26], 0  ;;  %s3697_s26 = smov [#allocation7]   ;;  %s3698_s3 = smov [#allocation10]  }
  0x10   :  { %s59_s27 = sshll.u32 %s3697_s26, 4  ;;  %s81_s28 = sshll.u32 %s3698_s3, 4  ;;  %s60_s27 = int_to_ptr.vmem [resolvable:$true] %s59_s27  ;;  %s82_s28 = int_to_ptr.vmem [resolvable:$true] %s81_s28 }
  0x11   :  { %s3407_s29 = scalar_lea.vmem %s60_s27, 512  ;;  %p3412_p1 = scmp.lt.s32.totalorder %s60_s27, %s60_s27 }
  0x12   :  { %p3408_p0 = scmp.ne.s32.totalorder %s60_s27, %s3407_s29  ;;  %p3413_p2 = scmp.lt.s32.totalorder %s3407_s29, %s3407_s29 }
  0x14   :  { %p3414_p3 = por %p3413_p2, %p3412_p1 }
  0x16   :  { %p3415_p4 = pnand %p3414_p3, %p3408_p0 }
  0x18   :  { %3418 = shalt.err (!%p3415_p4)
}
  0x19   :  { %s3699_s13 = smov 128   ;;  %s3700_s0 = smov 8  }
  0x1a   :  { %s4261_s5 = sld [smem:[#allocation39_spill]]  ;;  %s3427_s22 = scalar_lea.vmem %s82_s28, 512 }
  0x1b   :  { %p3428_p5 = scmp.ne.s32.totalorder %s82_s28, %s3427_s22  ;;  %p3432_p6 = scmp.lt.s32.totalorder %s82_s28, %s82_s28 }
  0x1c   :  { %p3433_p7 = scmp.lt.s32.totalorder %s3427_s22, %s3427_s22 }
  0x1e   :  { %p3434_p8 = por %p3433_p7, %p3432_p6 }
  0x20   :  { %65 = dma.hbm_to_vmem [thread:$0]  %s4261_s5, 512, %s60_s27, [#allocation8], %s3699_s13, %s3699_s13, %s3700_s0  }
  0x21   :  { %p3435_p9 = pnand %p3434_p8, %p3428_p5 }
  0x23   :  { %3438 = shalt.err (!%p3435_p9)
}
  0x24   :  { %s4262_s24 = sld [smem:[#allocation41_spill]]  ;;  %s3701_s2 = smov [#allocation13]  }
  0x25   :  { %s103_s25 = sshll.u32 %s3701_s2, 4  ;;  %s3702_s26 = smov [#allocation16]   ;;  %s104_s25 = int_to_ptr.vmem [resolvable:$true] %s103_s25 }
  0x26   :  { %s128_s3 = sshll.u32 %s3702_s26, 4  ;;  %s3447_s27 = scalar_lea.vmem %s104_s25, 512  ;;  %s129_s3 = int_to_ptr.vmem [resolvable:$true] %s128_s3 }
  0x27   :  { %p3448_p10 = scmp.ne.s32.totalorder %s104_s25, %s3447_s27  ;;  %p3452_p11 = scmp.lt.s32.totalorder %s104_s25, %s104_s25 }
  0x28   :  { %p3453_p12 = scmp.lt.s32.totalorder %s3447_s27, %s3447_s27 }
  0x2a   :  { %87 = dma.hbm_to_vmem [thread:$0]  %s4262_s24, 512, %s82_s28, [#allocation11], %s3699_s13, %s3699_s13, %s3700_s0  }
  0x2b   :  { %p3454_p13 = por %p3453_p12, %p3452_p11 }
  0x2d   :  { %p3455_p0 = pnand %p3454_p13, %p3448_p10 }
  0x2f   :  { %3458 = shalt.err (!%p3455_p0)
}
  0x30   :  { %109 = dma.hbm_to_vmem [thread:$0]  %s4239_s7, 512, %s104_s25, [#allocation14], %s3699_s13, %s3699_s13, %s3700_s0  }
  0x31   :  { %s3467_s28 = scalar_lea.vmem %s129_s3, 16  ;;  %s3471_s30 = scalar_lea.vmem %s129_s3, 32 }
  0x32   :  { %p3468_p1 = scmp.ne.s32.totalorder %s129_s3, %s3467_s28  ;;  %p3472_p2 = scmp.lt.s32.totalorder %s129_s3, %s129_s3 }
  0x33   :  { %p3473_p3 = scmp.lt.s32.totalorder %s3471_s30, %s3467_s28 }
  0x35   :  { %p3474_p4 = por %p3473_p3, %p3472_p2 }
  0x37   :  { %p3475_p5 = pnand %p3474_p4, %p3468_p1 }
  0x39   :  { %3478 = shalt.err (!%p3475_p5)
}
  0x3a   :  { %131 = dma.hbm_to_vmem [thread:$0]  %s4242_s10, 16, %s129_s3, [#allocation17]  }
  0x3b   :  { %s3703_s23 = smov [#allocation19]   ;;  %s3704_s24 = smov [#allocation4]  }
  0x3c   :  { %s148_s1 = sshll.u32 %s3703_s23, 4  ;;  %s43_s2 = sshll.u32 %s3704_s24, 4  ;;  %s149_s1 = int_to_ptr.vmem [resolvable:$true] %s148_s1  ;;  %s44_s2 = int_to_ptr.vmem [resolvable:$true] %s43_s2 }
  0x3d   :  { %s3487_s26 = scalar_lea.vmem %s149_s1, 16  ;;  %s3491_s7 = scalar_lea.vmem %s149_s1, 32 }
  0x3e   :  { %p3488_p6 = scmp.ne.s32.totalorder %s149_s1, %s3487_s26  ;;  %p3492_p7 = scmp.lt.s32.totalorder %s149_s1, %s149_s1 }
  0x3f   :  { %p3493_p8 = scmp.lt.s32.totalorder %s3491_s7, %s3487_s26 }
  0x41   :  { %p3494_p9 = por %p3493_p8, %p3492_p7 }
  0x43   :  { %p3495_p10 = pnand %p3494_p9, %p3488_p6 }
  0x45   :  { %3498 = shalt.err (!%p3495_p10)
}
  0x46   :  { %151 = dma.hbm_to_vmem [thread:$0]  %s4244_s12, 16, %s149_s1, [#allocation20]  }
  0x47   :  { %s3507_s29 = scalar_lea.vmem %s44_s2, 256  ;;  %p3512_p12 = scmp.lt.s32.totalorder %s44_s2, %s44_s2 }
  0x48   :  { %p3508_p11 = scmp.ne.s32.totalorder %s44_s2, %s3507_s29  ;;  %p3513_p13 = scmp.lt.s32.totalorder %s3507_s29, %s3507_s29 }
  0x4a   :  { %p3514_p0 = por %p3513_p13, %p3512_p12 }
  0x4c   :  { %p3515_p1 = pnand %p3514_p0, %p3508_p11 }
  0x4e   :  { %3518 = shalt.err (!%p3515_p1)
}
  0x4f   :  { %s4263_s4 = sld [smem:[#allocation36_spill]]  ;;  %s3705_s28 = smov [#allocation9]  }
  0x50   :  { %s72_s30 = sshll.u32 %s3705_s28, 4  ;;  %s3706_s5 = smov [#allocation12]   ;;  %s73_s30 = int_to_ptr.vmem [resolvable:$true] %s72_s30 }
  0x51   :  { %s94_s22 = sshll.u32 %s3706_s5, 4  ;;  %s3527_s12 = scalar_lea.vmem %s73_s30, 16  ;;  %s95_s22 = int_to_ptr.vmem [resolvable:$true] %s94_s22 }
  0x52   :  { %p3528_p2 = scmp.ne.s32.totalorder %s73_s30, %s3527_s12  ;;  %s3531_s23 = scalar_lea.vmem %s73_s30, 32 }
  0x53   :  { %p3532_p3 = scmp.lt.s32.totalorder %s73_s30, %s73_s30  ;;  %p3533_p4 = scmp.lt.s32.totalorder %s3531_s23, %s3527_s12 }
  0x55   :  { %49 = dma.hbm_to_vmem [thread:$0]  %s4263_s4, 256, %s44_s2, [#allocation5], %s3699_s13, %s3699_s13, %s3700_s0  }
  0x56   :  { %p3534_p5 = por %p3533_p4, %p3532_p3 }
  0x58   :  { %p3535_p6 = pnand %p3534_p5, %p3528_p2 }
  0x5a   :  { %3538 = shalt.err (!%p3535_p6)
}
  0x5b   :  { %s4264_s26 = sld [smem:[#allocation40_spill]]  ;;  %s3547_s7 = scalar_lea.vmem %s95_s22, 16 }
  0x5c   :  { %p3548_p7 = scmp.ne.s32.totalorder %s95_s22, %s3547_s7  ;;  %s3551_s2 = scalar_lea.vmem %s95_s22, 32 }
  0x5d   :  { %p3552_p8 = scmp.lt.s32.totalorder %s95_s22, %s95_s22  ;;  %p3553_p9 = scmp.lt.s32.totalorder %s3551_s2, %s3547_s7 }
  0x5f   :  { %p3554_p10 = por %p3553_p9, %p3552_p8 }
  0x61   :  { %75 = dma.hbm_to_vmem [thread:$0]  %s4264_s26, 16, %s73_s30, [#allocation8]  }
  0x62   :  { %p3555_p11 = pnand %p3554_p10, %p3548_p7 }
  0x64   :  { %3558 = shalt.err (!%p3555_p11)
}
  0x65   :  { %97 = dma.hbm_to_vmem [thread:$0]  %s4238_s6, 16, %s95_s22, [#allocation11]  }
  0x66   :  { %s3707_s29 = smov [#allocation15]   ;;  %s3708_s3 = smov [#allocation18]  }
  0x67   :  { %s116_s10 = sshll.u32 %s3707_s29, 4  ;;  %s138_s4 = sshll.u32 %s3708_s3, 4  ;;  %s117_s10 = int_to_ptr.vmem [resolvable:$true] %s116_s10  ;;  %s139_s4 = int_to_ptr.vmem [resolvable:$true] %s138_s4 }
  0x68   :  { %s3567_s28 = scalar_lea.vmem %s117_s10, 16  ;;  %s3571_s30 = scalar_lea.vmem %s117_s10, 32 }
  0x69   :  { %p3568_p12 = scmp.ne.s32.totalorder %s117_s10, %s3567_s28  ;;  %p3572_p13 = scmp.lt.s32.totalorder %s117_s10, %s117_s10 }
  0x6a   :  { %p3573_p0 = scmp.lt.s32.totalorder %s3571_s30, %s3567_s28 }
  0x6c   :  { %p3574_p1 = por %p3573_p0, %p3572_p13 }
  0x6e   :  { %p3575_p2 = pnand %p3574_p1, %p3568_p12 }
  0x70   :  { %3578 = shalt.err (!%p3575_p2)
}
  0x71   :  { %119 = dma.hbm_to_vmem [thread:$0]  %s4240_s8, 16, %s117_s10, [#allocation14]  }
  0x72   :  { %s3587_s23 = scalar_lea.vmem %s139_s4, 16  ;;  %s3591_s6 = scalar_lea.vmem %s139_s4, 32 }
  0x73   :  { %p3588_p3 = scmp.ne.s32.totalorder %s139_s4, %s3587_s23  ;;  %p3592_p4 = scmp.lt.s32.totalorder %s139_s4, %s139_s4 }
  0x74   :  { %p3593_p5 = scmp.lt.s32.totalorder %s3591_s6, %s3587_s23 }
  0x76   :  { %p3594_p6 = por %p3593_p5, %p3592_p4 }
  0x78   :  { %p3595_p7 = pnand %p3594_p6, %p3588_p3 }
  0x7a   :  { %3598 = shalt.err (!%p3595_p7)
}
  0x7b   :  { %141 = dma.hbm_to_vmem [thread:$0]  %s4243_s11, 16, %s139_s4, [#allocation17]  }
  0x7c   :  { %s3709_s24 = smov [#allocation21]   ;;  %s3710_s7 = smov [#allocation22]  }
  0x7d   :  { %s159_s26 = sshll.u32 %s3709_s24, 4  ;;  %s172_s2 = sshll.u32 %s3710_s7, 4  ;;  %s160_s26 = int_to_ptr.vmem [resolvable:$true] %s159_s26  ;;  %s173_s2 = int_to_ptr.vmem [resolvable:$true] %s172_s2 }
  0x7e   :  { %s3607_s25 = scalar_lea.vmem %s160_s26, 512  ;;  %p3612_p9 = scmp.lt.s32.totalorder %s160_s26, %s160_s26 }
  0x7f   :  { %p3608_p8 = scmp.ne.s32.totalorder %s160_s26, %s3607_s25  ;;  %p3613_p10 = scmp.lt.s32.totalorder %s3607_s25, %s3607_s25 }
  0x81   :  { %p3614_p11 = por %p3613_p10, %p3612_p9 }
  0x83   :  { %p3615_p12 = pnand %p3614_p11, %p3608_p8 }
  0x85   :  { %3618 = shalt.err (!%p3615_p12)
}
  0x86   :  { %165 = dma.hbm_to_vmem [thread:$0]  %s4246_s14, 512, %s160_s26, [#allocation20], %s3699_s13, %s3699_s13, %s3700_s0  }
  0x87   :  { %s3627_s11 = scalar_lea.vmem %s173_s2, 16  ;;  %s3631_s29 = scalar_lea.vmem %s173_s2, 32 }
  0x88   :  { %p3628_p13 = scmp.ne.s32.totalorder %s173_s2, %s3627_s11  ;;  %p3632_p0 = scmp.lt.s32.totalorder %s173_s2, %s173_s2 }
  0x89   :  { %p3633_p1 = scmp.lt.s32.totalorder %s3631_s29, %s3627_s11 }
  0x8b   :  { %p3634_p2 = por %p3633_p1, %p3632_p0 }
  0x8d   :  { %p3635_p3 = pnand %p3634_p2, %p3628_p13 }
  0x8f   :  { %3638 = shalt.err (!%p3635_p3)
}
  0x90   :  { %175 = dma.hbm_to_vmem [thread:$0]  %s4247_s15, 16, %s173_s2, [#allocation23]  }
  0x91   :  { %3679 = dma.done.wait [#allocation5], 256  }
  0x92   :  { %3680 = vsyncadd [#allocation5], 4294967040 }
  0x93   :  { %3681 = dma.done.wait [#allocation8], 528  }
  0x94   :  { %3682 = vsyncadd [#allocation8], 4294966768 }
  0x95   :  { %3683 = dma.done.wait [#allocation11], 528  }
  0x96   :  { %3684 = vsyncadd [#allocation11], 4294966768 }
  0x97   :  { %3685 = dma.done.wait [#allocation14], 528  }
  0x98   :  { %3686 = vsyncadd [#allocation14], 4294966768 }
  0x99   :  { %3687 = dma.done.wait [#allocation17], 32  }
  0x9a   :  { %3688 = vsyncadd [#allocation17], 4294967264 }
  0x9b   :  { %3689 = dma.done.wait [#allocation20], 528  }
  0x9c   :  { %3690 = vsyncadd [#allocation20], 4294966768 }
  0x9d   :  { %3691 = dma.done.wait [#allocation23], 16  }
  0x9e   :  { %3692 = vsyncadd [#allocation23], 4294967280  ;;  %v318_v1 = vld [vmem:[#allocation7 + $0x18] sm:$0xff]  ;;  %s4265_s28 = sld [smem:[#allocation37_spill]]  ;;  %v317_v3 = vld [vmem:[#allocation7 + $0x10] sm:$0xff]  ;;  %vm233_vm0 = vcmask 261120  }
  0x9f   :  { %3137 = vmatprep.subr.mxu1 %v318_v1  ;;  %v316_v5 = vld [vmem:[#allocation7 + $0x8] sm:$0xff]  ;;  %v315_v7 = vld [vmem:[#allocation7] sm:$0xff]  ;;  %v3895_v8 = vld [vmem:[#allocation4] sm:$0xff]  ;;  %v3711_v15 = vmov 0.0   ;;  %vm3712_vm1 = vmmov 0   ;;  %s4266_s29 = sld [smem:[#allocation38_spill]] }
  0xa0   :  { %3138 = vmatpush3.msra.mxu1 %v318_v1  ;;  %v3900_v10 = vld [vmem:[#allocation4 + $0x8] sm:$0xff]  ;;  %3145 = vmatprep.mubr.msk.f32.mxu1 %vm233_vm0, %v3895_v8  ;;  %v402_v13 = vld [vmem:[#allocation10 + $0x8] sm:$0xff]  ;;  %v401_v14 = vld [vmem:[#allocation10] sm:$0xff]  ;;  %vm606_vm2 = vcmask 64512   ;;  %vm573_vm3 = vcmask 31744   ;;  %s3714_s10 = smov 112  }
  0xa1   :  { %3139 = vmatprep.subr.mxu1 %v317_v3  ;;  %v404_v11 = vld [vmem:[#allocation10 + $0x18] sm:$0xff]  ;;  %3134 = vmatprep.mubr.msk.f32.mxu0 %vm233_vm0, %v3895_v8  ;;  %v403_v12 = vld [vmem:[#allocation10 + $0x10] sm:$0xff]  ;;  %v488_v18 = vld [vmem:[%s4241_s9 + $0x8] sm:$0xff]  ;;  %s3716_s3 = smov 104  }
  0xa2   :  { %3140 = vmatpush3.msra.mxu1 %v317_v3  ;;  %v490_v16 = vld [vmem:[%s4241_s9 + $0x18] sm:$0xff]  ;;  %v489_v17 = vld [vmem:[%s4241_s9 + $0x10] sm:$0xff]  ;;  %v2986_v19 = vld [vmem:[#allocation9] ss:$0 sm:$0xff] }
  0xa3   :  { %3141 = vmatprep.subr.mxu1 %v316_v5  ;;  %v487_v20 = vld [vmem:[%s4241_s9] sm:$0xff]  ;;  %s3713_s9 = smov 120  }
  0xa4   :  { %v225_v2 = vld [vmem:[%s4265_s28 + $0x18] sm:$0xff]  ;;  %v224_v4 = vld [vmem:[%s4265_s28 + $0x10] sm:$0xff]  ;;  %v223_v6 = vld [vmem:[%s4265_s28 + $0x8] sm:$0xff]  ;;  %3142 = vmatpush3.msra.mxu1 %v316_v5 }
  0xa5   :  { %3126 = vmatprep.subr.mxu0 %v225_v2  ;;  %v222_v9 = vld [vmem:[%s4265_s28] sm:$0xff]  ;;  %3143 = vmatprep.subr.mxu1 %v315_v7 }
  0xa6   :  { %3127 = vmatpush3.msra.mxu0 %v225_v2  ;;  %3144 = vmatpush3.msra.mxu1 %v315_v7  ;;  %v2983_v22 = vld [vmem:[%s4266_s29] ss:$0 sm:$0xff]  ;;  %v2989_v30 = vld [vmem:[#allocation12] ss:$0 sm:$0xff]  ;;  %v2992_v40 = vld [vmem:[#allocation16] ss:$0 sm:$0xff] }
  0xa7   :  { %3128 = vmatprep.subr.mxu0 %v224_v4  ;;  %3146 = vmatmul.mubr.msk.f32.vlgmr.msra.gmra.mxu1 %vm233_vm0, %v3900_v10  ;;  %v3715_v2 = vmov 0  }
  0xa8   :  { %3129 = vmatpush3.msra.mxu0 %v224_v4  ;;  %3167 = vmatprep.mubr.msk.f32.mxu1 %vm233_vm0, %v3895_v8 }
  0xa9   :  { %3130 = vmatprep.subr.mxu0 %v223_v6  ;;  %3159 = vmatprep.subr.mxu1 %v490_v16 }
  0xaa   :  { %3131 = vmatpush3.msra.mxu0 %v223_v6  ;;  %3160 = vmatpush3.msra.mxu1 %v490_v16 }
  0xab   :  { %3132 = vmatprep.subr.mxu0 %v222_v9  ;;  %3161 = vmatprep.subr.mxu1 %v489_v17 }
  0xac   :  { %3133 = vmatpush3.msra.mxu0 %v222_v9  ;;  %3162 = vmatpush3.msra.mxu1 %v489_v17 }
  0xad   :  { %3148 = vmatprep.subr.mxu0 %v404_v11  ;;  %3135 = vmatmul.mubr.msk.f32.vlgmr.msra.gmra.mxu0 %vm233_vm0, %v3900_v10 }
  0xae   :  { %3149 = vmatpush3.msra.mxu0 %v404_v11  ;;  %3156 = vmatprep.mubr.msk.f32.mxu0 %vm233_vm0, %v3895_v8 }
  0xaf   :  { %3150 = vmatprep.subr.mxu0 %v403_v12  ;;  %3163 = vmatprep.subr.mxu1 %v488_v18 }
  0xb0   :  { %3151 = vmatpush3.msra.mxu0 %v403_v12  ;;  %3164 = vmatpush3.msra.mxu1 %v488_v18  ;;  %v3986_v12 = vld [vmem:[#allocation13] sm:$0xff] }
  0xb1   :  { %3152 = vmatprep.subr.mxu0 %v402_v13  ;;  %3165 = vmatprep.subr.mxu1 %v487_v20 }
  0xb2   :  { %3153 = vmatpush3.msra.mxu0 %v402_v13  ;;  %3166 = vmatpush3.msra.mxu1 %v487_v20 }
  0xb3   :  { %3154 = vmatprep.subr.mxu0 %v401_v14  ;;  %3168 = vmatmul.mubr.msk.f32.vlgmr.msra.gmra.mxu1 %vm233_vm0, %v3900_v10 }
  0xb4   :  { %3155 = vmatpush3.msra.mxu0 %v401_v14  ;;  %3175 = vmatprep.subr.mxu1 %v3711_v15 }
  0xb5   :  { %3157 = vmatmul.mubr.msk.f32.vlgmr.msra.gmra.mxu0 %vm233_vm0, %v3900_v10  ;;  %3170 = vmatprep.subr.mxu0 %v3711_v15 }
  0xb6   :  { %3172 = vmatprep.mubr.msk.f32.mxu0 %vm3712_vm1, %v3711_v15  ;;  %3177 = vmatprep.mubr.msk.f32.mxu1 %vm3712_vm1, %v3711_v15 }
  0xb7   :  { %3337 = vset.pattern.permute.xlu0 %v3715_v2 }
 0x167   :  { %v3147_v21 = vpop.f32.mrf.mxu1 }
 0x168   :  { %v3934_v23 = vadd.f32 %v3147_v21, %v2986_v19 }
 0x169   :  { %v392_v25 = vpop.f32.mrf.mxu1 }
 0x16a   :  { %v3938_v27 = vadd.f32 %v2986_v19, %v392_v25 }
 0x16c   :  { %853 = vrot.lane.b32.xlu1 %v3938_v27, %s3713_s9  ;;  %3171 = vmatpush3.xpose.msk.msra.mxu0 %vm606_vm2, %v3938_v27 }
 0x16d   :  { %v3136_v24 = vpop.f32.mrf.mxu0  ;;  %3180 = vmatprep.subr.mxu0 %v3711_v15 }
 0x16e   :  { %v3936_v26 = vadd.f32 %v3136_v24, %v2983_v22 }
 0x16f   :  { %v306_v28 = vpop.f32.mrf.mxu0 }
 0x170   :  { %v3947_v29 = vadd.f32 %v2983_v22, %v306_v28 }
 0x172   :  { %3173 = vmatmul.mubr.msk.f32.vlgmr.msra.gmra.mxu0 %vm606_vm2, %v3947_v29  ;;  %851 = vrot.lane.b32.xlu1 %v3947_v29, %s3713_s9 }
 0x173   :  { %3182 = vmatprep.mubr.msk.f32.mxu0 %vm3712_vm1, %v3711_v15  ;;  %v3169_v39 = vpop.f32.mrf.mxu1  ;;  %3181 = vmatpush3.msra.mxu0 %v3986_v12 }
 0x174   :  { %v3965_v41 = vadd.f32 %v3169_v39, %v2992_v40  ;;  %3190 = vmatprep.subr.mxu0 %v3711_v15 }
 0x175   :  { %v3158_v31 = vpop.f32.mrf.mxu0  ;;  %v564_v45 = vpop.f32.mrf.mxu1 }
 0x176   :  { %v3958_v32 = vadd.f32 %v3158_v31, %v2989_v30  ;;  %v565_v46 = vadd.f32 %v2992_v40, %v564_v45 }
 0x177   :  { %v478_v33 = vpop.f32.mrf.mxu0 }
 0x178   :  { %v3960_v34 = vadd.f32 %v2989_v30, %v478_v33  ;;  %v574_v49 = vsel %vm573_vm3, %v565_v46, -inf }
 0x17a   :  { %3176 = vmatpush3.msra.mxu1 %v3960_v34 }
 0x17b   :  { %3185 = vmatprep.subr.mxu1 %v3711_v15 }
 0x1de   :  { %v854_v55 = vpop.permute.xlu1 %853 }
 0x1e4   :  { %v852_v57 = vpop.permute.xlu1 %851 }
 0x232   :  { %v679_v35 = vpop.f32.mrf.mxu0 }
 0x233   :  { %v683_v36 = vmul.f32 0.35355338, %v679_v35 }
 0x234   :  { %v3174_v37 = vpop.f32.mrf.mxu0 }
 0x235   :  { %v684_v38 = vsel %vm606_vm2, %v683_v36, -inf  ;;  %v3717_v37 = vmov 1  }
 0x236   :  { %685 = vmax.xlane.f32.xlu0 %v684_v38 }
 0x2bf   :  { %v686_v42 = vpop.xlane.xlu0 %685 }
 0x2c0   :  { %v687_v43 = vsub.f32 %v683_v36, %v686_v42 }
 0x2c2   :  { %v688_v44 = vmul.f32 1.442695, %v687_v43 }
 0x2c4   :  { %3346 = vpow2.f32 %v688_v44  ;;  %v4017_v44 = vld [vmem:[#allocation13 + $0x8] sm:$0xff] }
 0x2d1   :  { %v3347_v47 = vpop.eup %3346 }
 0x2d2   :  { %v690_v48 = vsel %vm606_vm2, %v3347_v47, 0.0 }
 0x2d3   :  { %691 = vadd.xlane.f32.xlu0 %v690_v48 }
 0x2d7   :  { %575 = vmax.xlane.f32.xlu0 %v574_v49 }
 0x35c   :  { %v692_v50 = vpop.xlane.xlu0 %691 }
 0x35d   :  { %3348 = vrcp.f32 %v692_v50 }
 0x360   :  { %v576_v51 = vpop.xlane.xlu0 %575 }
 0x361   :  { %v580_v52 = vsub.f32 %v565_v46, %v576_v51  ;;  %v3718_v51 = vmov 2  }
 0x362   :  { %3339 = vset.pattern.permute.xlu1 %v3718_v51 }
 0x363   :  { %v582_v53 = vmul.f32 1.442695, %v580_v52  ;;  %v4037_v52 = vld [vmem:[#allocation15] ss:$0 sm:$0xff] }
 0x365   :  { %3350 = vpow2.f32 %v582_v53 }
 0x36a   :  { %v3349_v54 = vpop.eup %3348 }
 0x36b   :  { %v695_v56 = vmul.f32 %v3349_v54, %v3347_v47 }
 0x36d   :  { %696 = vst.msk [vmem:[#allocation25] sm:$0xff] %vm606_vm2, %v695_v56  ;;  %3178 = vmatmul.mubr.msk.f32.vlgmr.msra.gmra.mxu1 %vm606_vm2, %v695_v56 }
 0x36e   :  { %3186 = vmatpush3.xpose.msk.msra.mxu1 %vm606_vm2, %v854_v55  ;;  %3187 = vmatprep.mubr.msk.f32.mxu1 %vm3712_vm1, %v3711_v15 }
 0x36f   :  { %3195 = vmatprep.subr.mxu1 %v3711_v15 }
 0x371   :  { %3188 = vmatmul.mubr.msk.f32.vlgmr.msra.gmra.mxu1 %vm606_vm2, %v852_v57 }
 0x372   :  { %v3351_v58 = vpop.eup %3350  ;;  %3197 = vmatprep.mubr.msk.f32.mxu1 %vm3712_vm1, %v3711_v15  ;;  %3196 = vmatpush3.msra.mxu1 %v4017_v44 }
 0x373   :  { %v586_v59 = vsel %vm573_vm3, %v3351_v58, 0.0  ;;  %3205 = vmatprep.subr.mxu1 %v3711_v15 }
 0x374   :  { %587 = vadd.xlane.f32.xlu0 %v586_v59 }
 0x3fd   :  { %v588_v9 = vpop.xlane.xlu0 %587 }
 0x42d   :  { %v766_v60 = vpop.f32.mrf.mxu1 }
 0x42f   :  { %v3179_v61 = vpop.f32.mrf.mxu1 }
 0x431   :  { %v925_v62 = vpop.f32.mrf.mxu1 }
 0x432   :  { %v929_v63 = vmul.f32 0.35355338, %v925_v62 }
 0x433   :  { %v3189_v0 = vpop.f32.mrf.mxu1 }
 0x434   :  { %v930_v1 = vsel %vm606_vm2, %v929_v63, -inf }
 0x435   :  { %931 = vmax.xlane.f32.xlu1 %v930_v1 }
 0x446   :  { %945 = vrot.lane.b32.xlu1 %v3960_v34, %s3713_s9 }
 0x44a   :  { %1103 = vrot.lane.b32.xlu1 %v3938_v27, %s3714_s10 }
 0x4be   :  { %v932_v3 = vpop.xlane.xlu1 %931 }
 0x4bf   :  { %v933_v4 = vsub.f32 %v929_v63, %v932_v3  ;;  %v4041_v63 = vld [vmem:[#allocation13 + $0x10] sm:$0xff] }
 0x4c1   :  { %v934_v5 = vmul.f32 1.442695, %v933_v4 }
 0x4c2   :  { %v946_v18 = vpop.permute.xlu1 %945 }
 0x4c3   :  { %3352 = vpow2.f32 %v934_v5 }
 0x4c4   :  { %3354 = vrcp.f32 %v588_v9 }
 0x4c6   :  { %v1104_v21 = vpop.permute.xlu1 %1103 }
 0x4d0   :  { %v3353_v6 = vpop.eup %3352 }
 0x4d1   :  { %v936_v7 = vsel %vm606_vm2, %v3353_v6, 0.0  ;;  %v3355_v11 = vpop.eup %3354 }
 0x4d2   :  { %937 = vadd.xlane.f32.xlu0 %v936_v7  ;;  %v3989_v13 = vmul.f32 %v3355_v11, %v3351_v58 }
 0x4e8   :  { %772 = vperm.xlu0 %3337, %v3989_v13  }
 0x4ec   :  { %1101 = vrot.lane.b32.xlu0 %v3947_v29, %s3714_s10 }
 0x4ed   :  { %3338 = vset.pattern.permute.xlu0 %v3717_v37 }
 0x55b   :  { %v938_v14 = vpop.xlane.xlu0 %937 }
 0x55c   :  { %3356 = vrcp.f32 %v938_v14 }
 0x563   :  { %v773_v16 = vpop.permute.xlu0 %772 }
 0x564   :  { %v775_v17 = vmul.f32 %v773_v16, %v766_v60 }
 0x566   :  { %3183 = vmatmul.mubr.msk.f32.vlgmr.msra.gmra.mxu0 %vm606_vm2, %v775_v17 }
 0x567   :  { %3191 = vmatpush3.msra.mxu0 %v946_v18  ;;  %3192 = vmatprep.mubr.msk.f32.mxu0 %vm3712_vm1, %v3711_v15  ;;  %v1102_v22 = vpop.permute.xlu0 %1101 }
 0x568   :  { %3200 = vmatprep.subr.mxu0 %v3711_v15 }
 0x569   :  { %v3357_v19 = vpop.eup %3356 }
 0x56a   :  { %v941_v20 = vmul.f32 %v3357_v19, %v3353_v6  ;;  %v3719_v19 = vmov 3  }
 0x56c   :  { %943 = vst.msk [vmem:[#allocation25 + $0x8] sm:$0xff] %vm606_vm2, %v941_v20  ;;  %3193 = vmatmul.mubr.msk.f32.vlgmr.msra.gmra.mxu0 %vm606_vm2, %v941_v20 }
 0x56d   :  { %3201 = vmatpush3.xpose.msk.msra.mxu0 %vm606_vm2, %v1104_v21  ;;  %3202 = vmatprep.mubr.msk.f32.mxu0 %vm3712_vm1, %v3711_v15 }
 0x56e   :  { %3210 = vmatprep.subr.mxu0 %v3711_v15 }
 0x570   :  { %3203 = vmatmul.mubr.msk.f32.vlgmr.msra.gmra.mxu0 %vm606_vm2, %v1102_v22 }
 0x571   :  { %3212 = vmatprep.mubr.msk.f32.mxu0 %vm3712_vm1, %v3711_v15  ;;  %3211 = vmatpush3.msra.mxu0 %v4041_v63 }
 0x572   :  { %3220 = vmatprep.subr.mxu0 %v3711_v15 }
 0x626   :  { %v846_v24 = vpop.f32.mrf.mxu0 }
 0x627   :  { %v850_v53 = vadd.f32 %v4037_v52, %v846_v24 }
 0x628   :  { %v3184_v25 = vpop.f32.mrf.mxu0 }
 0x62c   :  { %v1017_v28 = vpop.f32.mrf.mxu0 }
 0x62e   :  { %v3194_v30 = vpop.f32.mrf.mxu0 }
 0x62f   :  { %v577_v30 = vsel %vm573_vm3, %v3965_v41, -inf }
 0x630   :  { %v1175_v31 = vpop.f32.mrf.mxu0 }
 0x631   :  { %v1179_v33 = vmul.f32 0.35355338, %v1175_v31 }
 0x632   :  { %v3204_v35 = vpop.f32.mrf.mxu0 }
 0x633   :  { %v1180_v36 = vsel %vm606_vm2, %v1179_v33, -inf }
 0x634   :  { %1181 = vmax.xlane.f32.xlu1 %v1180_v36 }
 0x645   :  { %1194 = vrot.lane.b32.xlu1 %v3960_v34, %s3714_s10 }
 0x649   :  { %1352 = vrot.lane.b32.xlu1 %v3938_v27, %s3716_s3 }
 0x64d   :  { %1350 = vrot.lane.b32.xlu1 %v3947_v29, %s3716_s3 }
 0x6bd   :  { %v1182_v38 = vpop.xlane.xlu1 %1181 }
 0x6be   :  { %v1183_v39 = vsub.f32 %v1179_v33, %v1182_v38 }
 0x6c0   :  { %v1184_v40 = vmul.f32 1.442695, %v1183_v39 }
 0x6c1   :  { %v1195_v29 = vpop.permute.xlu1 %1194 }
 0x6c2   :  { %3358 = vpow2.f32 %v1184_v40 }
 0x6c5   :  { %v1353_v48 = vpop.permute.xlu1 %1352 }
 0x6c9   :  { %v1351_v50 = vpop.permute.xlu1 %1350 }
 0x6cf   :  { %v3359_v42 = vpop.eup %3358 }
 0x6d0   :  { %v1186_v43 = vsel %vm606_vm2, %v3359_v42, 0.0 }
 0x6d1   :  { %1187 = vadd.xlane.f32.xlu0 %v1186_v43 }
 0x6e7   :  { %1022 = vperm.xlu0 %3338, %v3989_v13  }
 0x6eb   :  { %3341 = vset.pattern.permute.xlu0 %v3715_v2 }
 0x75a   :  { %v1188_v27 = vpop.xlane.xlu0 %1187 }
 0x75b   :  { %3360 = vrcp.f32 %v1188_v27 }
 0x762   :  { %v1023_v45 = vpop.permute.xlu0 %1022 }
 0x763   :  { %v1025_v46 = vmul.f32 %v1023_v45, %v1017_v28 }
 0x765   :  { %3198 = vmatmul.mubr.msk.f32.vlgmr.msra.gmra.mxu1 %vm606_vm2, %v1025_v46 }
 0x766   :  { %3206 = vmatpush3.msra.mxu1 %v1195_v29  ;;  %3207 = vmatprep.mubr.msk.f32.mxu1 %vm3712_vm1, %v3711_v15 }
 0x767   :  { %3215 = vmatprep.subr.mxu1 %v3711_v15 }
 0x768   :  { %v3361_v47 = vpop.eup %3360 }
 0x769   :  { %v1191_v49 = vmul.f32 %v3361_v47, %v3359_v42 }
 0x76b   :  { %1193 = vst.msk [vmem:[#allocation25 + $0x10] sm:$0xff] %vm606_vm2, %v1191_v49  ;;  %3208 = vmatmul.mubr.msk.f32.vlgmr.msra.gmra.mxu1 %vm606_vm2, %v1191_v49 }
 0x76c   :  { %3216 = vmatpush3.xpose.msk.msra.mxu1 %vm606_vm2, %v1353_v48  ;;  %3217 = vmatprep.mubr.msk.f32.mxu1 %vm3712_vm1, %v3711_v15 }
 0x76d   :  { %3225 = vmatprep.subr.mxu1 %v3711_v15 }
 0x76f   :  { %3218 = vmatmul.mubr.msk.f32.vlgmr.msra.gmra.mxu1 %vm606_vm2, %v1351_v50 }
 0x770   :  { %3227 = vmatprep.mubr.msk.f32.mxu1 %vm3712_vm1, %v3711_v15 }
 0x825   :  { %v1096_v54 = vpop.f32.mrf.mxu1 }
 0x826   :  { %v1100_v55 = vadd.f32 %v1096_v54, %v850_v53 }
 0x827   :  { %v3199_v56 = vpop.f32.mrf.mxu1 }
 0x82b   :  { %v1266_v57 = vpop.f32.mrf.mxu1 }
 0x82d   :  { %v3209_v58 = vpop.f32.mrf.mxu1 }
 0x82f   :  { %v1424_v59 = vpop.f32.mrf.mxu1 }
 0x830   :  { %v1428_v60 = vmul.f32 0.35355338, %v1424_v59 }
 0x831   :  { %v3219_v61 = vpop.f32.mrf.mxu1 }
 0x832   :  { %v1429_v62 = vsel %vm606_vm2, %v1428_v60, -inf }
 0x833   :  { %1430 = vmax.xlane.f32.xlu1 %v1429_v62 }
 0x844   :  { %1271 = vperm.xlu1 %3339, %v3989_v13  }
 0x848   :  { %3340 = vset.pattern.permute.xlu1 %v3719_v19 }
 0x8bc   :  { %v1431_v0 = vpop.xlane.xlu1 %1430 }
 0x8bd   :  { %v1432_v1 = vsub.f32 %v1428_v60, %v1431_v0 }
 0x8bf   :  { %v1433_v3 = vmul.f32 1.442695, %v1432_v1 }
 0x8c0   :  { %v1272_v4 = vpop.permute.xlu1 %1271 }
 0x8c1   :  { %3362 = vpow2.f32 %v1433_v3  ;;  %v1274_v5 = vmul.f32 %v1272_v4, %v1266_v57 }
 0x8c3   :  { %3213 = vmatmul.mubr.msk.f32.vlgmr.msra.gmra.mxu0 %vm606_vm2, %v1274_v5 }
 0x8c4   :  { %3222 = vmatprep.mubr.msk.f32.mxu0 %vm3712_vm1, %v3711_v15 }
 0x8ce   :  { %v3363_v6 = vpop.eup %3362 }
 0x8cf   :  { %v1435_v7 = vsel %vm606_vm2, %v3363_v6, 0.0 }
 0x8d0   :  { %1436 = vadd.xlane.f32.xlu0 %v1435_v7 }
 0x8e6   :  { %1443 = vrot.lane.b32.xlu0 %v3960_v34, %s3716_s3 }
 0x959   :  { %v1437_v9 = vpop.xlane.xlu0 %1436 }
 0x95a   :  { %3364 = vrcp.f32 %v1437_v9 }
 0x95d   :  { %v1444_v11 = vpop.permute.xlu0 %1443 }
 0x95e   :  { %3221 = vmatpush3.msra.mxu0 %v1444_v11 }
 0x95f   :  { %3230 = vmatprep.subr.mxu0 %v3711_v15 }
 0x967   :  { %v3365_v14 = vpop.eup %3364 }
 0x968   :  { %v1440_v16 = vmul.f32 %v3365_v14, %v3363_v6 }
 0x96a   :  { %1442 = vst.msk [vmem:[#allocation25 + $0x18] sm:$0xff] %vm606_vm2, %v1440_v16  ;;  %3223 = vmatmul.mubr.msk.f32.vlgmr.msra.gmra.mxu0 %vm606_vm2, %v1440_v16 }
 0x96b   :  { %3231 = vmatpush3.xpose.msk.msra.mxu0 %vm606_vm2, %v3934_v23  ;;  %3232 = vmatprep.mubr.msk.f32.mxu0 %vm3712_vm1, %v3711_v15 }
 0x96c   :  { %3240 = vmatprep.subr.mxu0 %v3711_v15 }
 0x96e   :  { %3233 = vmatmul.mubr.msk.f32.vlgmr.msra.gmra.mxu0 %vm606_vm2, %v3936_v26 }
 0x96f   :  { %3241 = vmatpush3.msra.mxu0 %v3986_v12  ;;  %3242 = vmatprep.mubr.msk.f32.mxu0 %vm3712_vm1, %v3711_v15  ;;  %v4068_v12 = vld [vmem:[#allocation13 + $0x18] sm:$0xff] }
 0x970   :  { %3250 = vmatprep.subr.mxu0 %v3711_v15  ;;  %3226 = vmatpush3.msra.mxu1 %v4068_v12 }
 0x971   :  { %3235 = vmatprep.subr.mxu1 %v3711_v15 }
 0x983   :  { %v1345_v34 = vpop.f32.mrf.mxu0 }
 0x984   :  { %v1349_v17 = vadd.f32 %v1345_v34, %v1100_v55 }
 0x985   :  { %v3214_v18 = vpop.f32.mrf.mxu0 }
 0xa2a   :  { %v1515_v20 = vpop.f32.mrf.mxu0 }
 0xa2c   :  { %v3224_v21 = vpop.f32.mrf.mxu0 }
 0xa2e   :  { %v1680_v22 = vpop.f32.mrf.mxu0 }
 0xa2f   :  { %v1684_v24 = vmul.f32 0.35355338, %v1680_v22 }
 0xa30   :  { %v3234_v25 = vpop.f32.mrf.mxu0 }
 0xa31   :  { %v1685_v28 = vsel %vm606_vm2, %v1684_v24, -inf }
 0xa32   :  { %1686 = vmax.xlane.f32.xlu1 %v1685_v28 }
 0xa43   :  { %1520 = vperm.xlu1 %3340, %v3989_v13  }
 0xa47   :  { %1853 = vrot.lane.b32.xlu1 %v3936_v26, %s3713_s9 }
 0xa48   :  { %3342 = vset.pattern.permute.xlu1 %v3717_v37 }
 0xa6b   :  { %578 = vmax.xlane.f32.xlu1 %v577_v30 }
 0xabb   :  { %v1687_v31 = vpop.xlane.xlu1 %1686 }
 0xabc   :  { %v1688_v33 = vsub.f32 %v1684_v24, %v1687_v31 }
 0xabe   :  { %v1689_v35 = vmul.f32 1.442695, %v1688_v33 }
 0xabf   :  { %v1521_v36 = vpop.permute.xlu1 %1520 }
 0xac0   :  { %3366 = vpow2.f32 %v1689_v35  ;;  %v1523_v38 = vmul.f32 %v1521_v36, %v1515_v20 }
 0xac2   :  { %3228 = vmatmul.mubr.msk.f32.vlgmr.msra.gmra.mxu1 %vm606_vm2, %v1523_v38 }
 0xac3   :  { %3236 = vmatpush3.msra.mxu1 %v3958_v32  ;;  %3237 = vmatprep.mubr.msk.f32.mxu1 %vm3712_vm1, %v3711_v15  ;;  %v1854_v39 = vpop.permute.xlu1 %1853 }
 0xac4   :  { %3245 = vmatprep.subr.mxu1 %v3711_v15 }
 0xacd   :  { %v3367_v13 = vpop.eup %3366 }
 0xace   :  { %v1691_v37 = vsel %vm606_vm2, %v3367_v13, 0.0 }
 0xacf   :  { %1692 = vadd.xlane.f32.xlu0 %v1691_v37 }
 0xae5   :  { %1855 = vrot.lane.b32.xlu0 %v3934_v23, %s3713_s9 }
 0xaf4   :  { %v579_v40 = vpop.xlane.xlu1 %578 }
 0xaf5   :  { %v581_v42 = vsub.f32 %v3965_v41, %v579_v40 }
 0xaf7   :  { %v584_v43 = vmul.f32 1.442695, %v581_v42 }
 0xaf9   :  { %3368 = vpow2.f32 %v584_v43 }
 0xb06   :  { %v3369_v27 = vpop.eup %3368 }
 0xb07   :  { %v589_v29 = vsel %vm573_vm3, %v3369_v27, 0.0 }
 0xb08   :  { %590 = vadd.xlane.f32.xlu1 %v589_v29 }
 0xb19   :  { %1947 = vrot.lane.b32.xlu1 %v3958_v32, %s3713_s9 }
 0xb1d   :  { %2105 = vrot.lane.b32.xlu1 %v3934_v23, %s3714_s10 }
 0xb58   :  { %v1693_v45 = vpop.xlane.xlu0 %1692 }
 0xb59   :  { %3370 = vrcp.f32 %v1693_v45 }
 0xb5c   :  { %v1856_v48 = vpop.permute.xlu0 %1855 }
 0xb66   :  { %v3371_v46 = vpop.eup %3370 }
 0xb67   :  { %v1696_v47 = vmul.f32 %v3371_v46, %v3367_v13 }
 0xb69   :  { %1698 = vst.msk [vmem:[#allocation25 + $0x20] sm:$0xff] %vm606_vm2, %v1696_v47  ;;  %3238 = vmatmul.mubr.msk.f32.vlgmr.msra.gmra.mxu1 %vm606_vm2, %v1696_v47 }
 0xb6a   :  { %3246 = vmatpush3.xpose.msk.msra.mxu1 %vm606_vm2, %v1856_v48  ;;  %3247 = vmatprep.mubr.msk.f32.mxu1 %vm3712_vm1, %v3711_v15 }
 0xb6b   :  { %3255 = vmatprep.subr.mxu1 %v3711_v15 }
 0xb6d   :  { %3248 = vmatmul.mubr.msk.f32.vlgmr.msra.gmra.mxu1 %vm606_vm2, %v1854_v39 }
 0xb6e   :  { %3256 = vmatpush3.msra.mxu1 %v4017_v44  ;;  %3257 = vmatprep.mubr.msk.f32.mxu1 %vm3712_vm1, %v3711_v15 }
 0xb6f   :  { %3265 = vmatprep.subr.mxu1 %v3711_v15 }
 0xb82   :  { %v1594_v41 = vpop.f32.mrf.mxu1 }
 0xb83   :  { %v1598_v49 = vadd.f32 %v1594_v41, %v1349_v17 }
 0xb84   :  { %v3229_v50 = vpop.f32.mrf.mxu1 }
 0xb85   :  { %1599 = vst.msk [vmem:[#allocation2] sm:$0xff] %vm233_vm0, %v1598_v49 }
 0xb91   :  { %v591_v59 = vpop.xlane.xlu1 %590 }
 0xb92   :  { %3372 = vrcp.f32 %v591_v59 }
 0xb95   :  { %v1948_v4 = vpop.permute.xlu1 %1947 }
 0xb99   :  { %v2106_v7 = vpop.permute.xlu1 %2105 }
 0xb9f   :  { %v3373_v44 = vpop.eup %3372 }
 0xba0   :  { %v4105_v60 = vmul.f32 %v3373_v44, %v3369_v27 }
 0xc29   :  { %v1768_v53 = vpop.f32.mrf.mxu1 }
 0xc2b   :  { %v3239_v54 = vpop.f32.mrf.mxu1 }
 0xc2d   :  { %v1927_v55 = vpop.f32.mrf.mxu1 }
 0xc2e   :  { %v1931_v56 = vmul.f32 0.35355338, %v1927_v55 }
 0xc2f   :  { %v3249_v57 = vpop.f32.mrf.mxu1 }
 0xc30   :  { %v1932_v58 = vsel %vm606_vm2, %v1931_v56, -inf  ;;  %v3030_v57 = vld [vmem:[#allocation19] ss:$0 sm:$0xff] }
 0xc31   :  { %1933 = vmax.xlane.f32.xlu0 %v1932_v58 }
 0xc47   :  { %1774 = vperm.xlu0 %3341, %v4105_v60  }
 0xcba   :  { %v1934_v61 = vpop.xlane.xlu0 %1933 }
 0xcbb   :  { %v1935_v62 = vsub.f32 %v1931_v56, %v1934_v61  ;;  %v4164_v56 = vld [vmem:[#allocation2] sm:$0xff] }
 0xcbc   :  { %v2626_v58 = vmul.f32 %v3030_v57, %v4164_v56 }
 0xcbd   :  { %v1936_v0 = vmul.f32 1.442695, %v1935_v62 }
 0xcbe   :  { %v2628_v59 = vsel %vm233_vm0, %v2626_v58, 0.0 }
 0xcbf   :  { %3374 = vpow2.f32 %v1936_v0 }
 0xcc2   :  { %v1775_v1 = vpop.permute.xlu0 %1774 }
 0xcc3   :  { %v1777_v3 = vmul.f32 %v1775_v1, %v1768_v53 }
 0xcc5   :  { %3243 = vmatmul.mubr.msk.f32.vlgmr.msra.gmra.mxu0 %vm606_vm2, %v1777_v3 }
 0xcc6   :  { %3251 = vmatpush3.msra.mxu0 %v1948_v4  ;;  %3252 = vmatprep.mubr.msk.f32.mxu0 %vm3712_vm1, %v3711_v15 }
 0xcc7   :  { %3260 = vmatprep.subr.mxu0 %v3711_v15 }
 0xccc   :  { %v3375_v5 = vpop.eup %3374 }
 0xccd   :  { %v1938_v6 = vsel %vm606_vm2, %v3375_v5, 0.0 }
 0xcce   :  { %1939 = vadd.xlane.f32.xlu1 %v1938_v6 }
 0xcdf   :  { %2103 = vrot.lane.b32.xlu1 %v3936_v26, %s3714_s10 }
 0xd57   :  { %v1940_v9 = vpop.xlane.xlu1 %1939 }
 0xd58   :  { %3376 = vrcp.f32 %v1940_v9 }
 0xd5b   :  { %v2104_v16 = vpop.permute.xlu1 %2103 }
 0xd65   :  { %v3377_v11 = vpop.eup %3376 }
 0xd66   :  { %v1943_v14 = vmul.f32 %v3377_v11, %v3375_v5 }
 0xd68   :  { %1945 = vst.msk [vmem:[#allocation25 + $0x28] sm:$0xff] %vm606_vm2, %v1943_v14  ;;  %3253 = vmatmul.mubr.msk.f32.vlgmr.msra.gmra.mxu0 %vm606_vm2, %v1943_v14 }
 0xd69   :  { %3261 = vmatpush3.xpose.msk.msra.mxu0 %vm606_vm2, %v2106_v7  ;;  %3262 = vmatprep.mubr.msk.f32.mxu0 %vm3712_vm1, %v3711_v15 }
 0xd6a   :  { %3270 = vmatprep.subr.mxu0 %v3711_v15 }
 0xd6c   :  { %3263 = vmatmul.mubr.msk.f32.vlgmr.msra.gmra.mxu0 %vm606_vm2, %v2104_v16 }
 0xd6d   :  { %3271 = vmatpush3.msra.mxu0 %v4041_v63  ;;  %3272 = vmatprep.mubr.msk.f32.mxu0 %vm3712_vm1, %v3711_v15 }
 0xd6e   :  { %3280 = vmatprep.subr.mxu0 %v3711_v15 }
 0xd85   :  { %v1848_v34 = vpop.f32.mrf.mxu0 }
 0xd86   :  { %v1852_v39 = vadd.f32 %v4037_v52, %v1848_v34  ;;  %v3029_v52 = vld [vmem:[#allocation18] ss:$0 sm:$0xff] }
 0xd87   :  { %v3244_v17 = vpop.f32.mrf.mxu0  ;;  %v2612_v44 = vmul.f32 %v3029_v52, %v3900_v10  ;;  %v3031_v10 = vld [vmem:[#allocation3] ss:$0 sm:$0xff] }
 0xe28   :  { %v2019_v18 = vpop.f32.mrf.mxu0 }
 0xe2a   :  { %v3254_v20 = vpop.f32.mrf.mxu0 }
 0xe2c   :  { %v2177_v21 = vpop.f32.mrf.mxu0 }
 0xe2d   :  { %v2181_v22 = vmul.f32 0.35355338, %v2177_v21 }
 0xe2e   :  { %v3264_v24 = vpop.f32.mrf.mxu0 }
 0xe2f   :  { %v2182_v25 = vsel %vm606_vm2, %v2181_v22, -inf  ;;  %v2923_v24 = vld [vmem:[#allocation25 + $0x8] sm:$0xff] }
 0xe30   :  { %2183 = vmax.xlane.f32.xlu1 %v2182_v25  ;;  %v2926_v25 = vld [vmem:[#allocation25 + $0x10] sm:$0xff] }
 0xe41   :  { %2024 = vperm.xlu1 %3342, %v4105_v60  }
 0xe45   :  { %2354 = vrot.lane.b32.xlu1 %v3934_v23, %s3716_s3 }
 0xe46   :  { %3343 = vset.pattern.permute.xlu1 %v3718_v51 }
 0xe49   :  { %2352 = vrot.lane.b32.xlu1 %v3936_v26, %s3716_s3 }
 0xeb9   :  { %v2184_v63 = vpop.xlane.xlu1 %2183 }
 0xeba   :  { %v2185_v28 = vsub.f32 %v2181_v22, %v2184_v63  ;;  %v2920_v22 = vld [vmem:[#allocation25] sm:$0xff]  ;;  %v2929_v63 = vld [vmem:[#allocation25 + $0x18] sm:$0xff] }
 0xebc   :  { %v2186_v30 = vmul.f32 1.442695, %v2185_v28 }
 0xebd   :  { %v2025_v31 = vpop.permute.xlu1 %2024 }
 0xebe   :  { %3378 = vpow2.f32 %v2186_v30  ;;  %v2027_v33 = vmul.f32 %v2025_v31, %v2019_v18 }
 0xec0   :  { %3258 = vmatmul.mubr.msk.f32.vlgmr.msra.gmra.mxu1 %vm606_vm2, %v2027_v33 }
 0xec1   :  { %3267 = vmatprep.mubr.msk.f32.mxu1 %vm3712_vm1, %v3711_v15  ;;  %v2355_v38 = vpop.permute.xlu1 %2354 }
 0xec5   :  { %v2353_v37 = vpop.permute.xlu1 %2352 }
 0xecb   :  { %v3379_v35 = vpop.eup %3378 }
 0xecc   :  { %v2188_v36 = vsel %vm606_vm2, %v3379_v35, 0.0 }
 0xecd   :  { %2189 = vadd.xlane.f32.xlu0 %v2188_v36 }
 0xee3   :  { %2196 = vrot.lane.b32.xlu0 %v3958_v32, %s3714_s10 }
 0xf56   :  { %v2190_v23 = vpop.xlane.xlu0 %2189 }
 0xf57   :  { %3380 = vrcp.f32 %v2190_v23 }
 0xf5a   :  { %v2197_v26 = vpop.permute.xlu0 %2196 }
 0xf5b   :  { %3266 = vmatpush3.msra.mxu1 %v2197_v26 }
 0xf5c   :  { %3275 = vmatprep.subr.mxu1 %v3711_v15 }
 0xf64   :  { %v3381_v51 = vpop.eup %3380 }
 0xf65   :  { %v2193_v13 = vmul.f32 %v3381_v51, %v3379_v35 }
 0xf67   :  { %2195 = vst.msk [vmem:[#allocation25 + $0x30] sm:$0xff] %vm606_vm2, %v2193_v13  ;;  %3268 = vmatmul.mubr.msk.f32.vlgmr.msra.gmra.mxu1 %vm606_vm2, %v2193_v13 }
 0xf68   :  { %3276 = vmatpush3.xpose.msk.msra.mxu1 %vm606_vm2, %v2355_v38  ;;  %3277 = vmatprep.mubr.msk.f32.mxu1 %vm3712_vm1, %v3711_v15 }
 0xf69   :  { %3285 = vmatprep.subr.mxu1 %v3711_v15 }
 0xf6b   :  { %3278 = vmatmul.mubr.msk.f32.vlgmr.msra.gmra.mxu1 %vm606_vm2, %v2353_v37 }
 0xf6c   :  { %3286 = vmatpush3.msra.mxu1 %v4068_v12  ;;  %3287 = vmatprep.mubr.msk.f32.mxu1 %vm3712_vm1, %v3711_v15  ;;  %v2611_v12 = vmul.f32 %v3029_v52, %v3895_v8  ;;  %v2688_v52 = vld [vmem:[#allocation21 + $0x18] sm:$0xff] }
 0xf6e   :  { %v2613_v41 = vsel %vm233_vm0, %v2611_v12, 0.0  ;;  %v2687_v12 = vld [vmem:[#allocation21 + $0x10] sm:$0xff] }
 0xf80   :  { %v2098_v40 = vpop.f32.mrf.mxu1 }
 0xf81   :  { %v2102_v42 = vadd.f32 %v2098_v40, %v1852_v39 }
 0xf82   :  { %v3259_v43 = vpop.f32.mrf.mxu1 }
0x1027   :  { %v2268_v27 = vpop.f32.mrf.mxu1 }
0x1029   :  { %v3269_v29 = vpop.f32.mrf.mxu1 }
0x102b   :  { %v2426_v45 = vpop.f32.mrf.mxu1 }
0x102c   :  { %v2430_v46 = vmul.f32 0.35355338, %v2426_v45 }
0x102d   :  { %v3279_v47 = vpop.f32.mrf.mxu1 }
0x102e   :  { %v2431_v48 = vsel %vm606_vm2, %v2430_v46, -inf }
0x102f   :  { %2432 = vmax.xlane.f32.xlu1 %v2431_v48 }
0x1040   :  { %2273 = vperm.xlu1 %3343, %v4105_v60  }
0x1044   :  { %3344 = vset.pattern.permute.xlu1 %v3719_v19 }
0x1045   :  { %2522 = vperm.xlu1 %3344, %v4105_v60   ;;  %v2616_v60 = vsel %vm233_vm0, %v2612_v44, 0.0 }
0x1049   :  { %3345 = vset.pattern.permute.xlu1 %v3715_v2 }
0x1069   :  { %2614 = vadd.xlane.f32.xlu1 %v2613_v41 }
0x106d   :  { %2617 = vadd.xlane.f32.xlu1 %v2616_v60  ;;  %v3398_v60 = vld [vmem:[#allocation4 + $0x8] sm:$0xff] }
0x10b8   :  { %v2433_v49 = vpop.xlane.xlu1 %2432 }
0x10b9   :  { %v2434_v50 = vsub.f32 %v2430_v46, %v2433_v49  ;;  %v2686_v49 = vld [vmem:[#allocation21 + $0x8] sm:$0xff] }
0x10bb   :  { %v2435_v53 = vmul.f32 1.442695, %v2434_v50  ;;  %v2685_v50 = vld [vmem:[#allocation21] sm:$0xff] }
0x10bc   :  { %v2274_v54 = vpop.permute.xlu1 %2273 }
0x10bd   :  { %3382 = vpow2.f32 %v2435_v53  ;;  %v2276_v55 = vmul.f32 %v2274_v54, %v2268_v27  ;;  %v2932_v53 = vld [vmem:[#allocation25 + $0x20] sm:$0xff]  ;;  %v2935_v54 = vld [vmem:[#allocation25 + $0x28] sm:$0xff] }
0x10bf   :  { %3273 = vmatmul.mubr.msk.f32.vlgmr.msra.gmra.mxu0 %vm606_vm2, %v2276_v55  ;;  %v2938_v55 = vld [vmem:[#allocation25 + $0x30] sm:$0xff] }
0x10c0   :  { %3282 = vmatprep.mubr.msk.f32.mxu0 %vm3712_vm1, %v3711_v15  ;;  %v2523_v4 = vpop.permute.xlu1 %2522 }
0x10ca   :  { %v3383_v19 = vpop.eup %3382 }
0x10cb   :  { %v2437_v2 = vsel %vm606_vm2, %v3383_v19, 0.0 }
0x10cc   :  { %2438 = vadd.xlane.f32.xlu0 %v2437_v2 }
0x10e2   :  { %2445 = vrot.lane.b32.xlu0 %v3958_v32, %s3716_s3 }
0x10f2   :  { %v2615_v5 = vpop.xlane.xlu1 %2614 }
0x10f6   :  { %v2618_v17 = vpop.xlane.xlu1 %2617 }
0x1101   :  { %2629 = vadd.xlane.f32.xlu0 %v2628_v59 }
0x1155   :  { %v2439_v15 = vpop.xlane.xlu0 %2438 }
0x1156   :  { %3384 = vrcp.f32 %v2439_v15 }
0x1159   :  { %v2446_v61 = vpop.permute.xlu0 %2445 }
0x115a   :  { %3281 = vmatpush3.msra.mxu0 %v2446_v61 }
0x115b   :  { %3290 = vmatprep.subr.mxu0 %v2688_v52 }
0x1163   :  { %v3385_v62 = vpop.eup %3384 }
0x1164   :  { %v2442_v0 = vmul.f32 %v3385_v62, %v3383_v19 }
0x1166   :  { %2444 = vst.msk [vmem:[#allocation25 + $0x38] sm:$0xff] %vm606_vm2, %v2442_v0  ;;  %3283 = vmatmul.mubr.msk.f32.vlgmr.msra.gmra.mxu0 %vm606_vm2, %v2442_v0  ;;  %v2782_v0 = vld [vmem:[%s4248_s16 + $0x18] sm:$0xff] }
0x1167   :  { %3291 = vmatpush3.msra.mxu0 %v2688_v52  ;;  %3301 = vmatprep.subr.mxu1 %v2782_v0 }
0x1168   :  { %3292 = vmatprep.subr.mxu0 %v2687_v12 }
0x1169   :  { %3293 = vmatpush3.msra.mxu0 %v2687_v12 }
0x116a   :  { %3294 = vmatprep.subr.mxu0 %v2686_v49 }
0x116b   :  { %3295 = vmatpush3.msra.mxu0 %v2686_v49 }
0x116c   :  { %3296 = vmatprep.subr.mxu0 %v2685_v50 }
0x116d   :  { %3297 = vmatpush3.msra.mxu0 %v2685_v50  ;;  %v2941_v19 = vld [vmem:[#allocation25 + $0x38] sm:$0xff] }
0x117f   :  { %v2347_v32 = vpop.f32.mrf.mxu0 }
0x1180   :  { %v2351_v1 = vadd.f32 %v2347_v32, %v2102_v42  ;;  %v2781_v32 = vld [vmem:[%s4248_s16 + $0x10] sm:$0xff] }
0x1181   :  { %v3274_v3 = vpop.f32.mrf.mxu0 }
0x1182   :  { %v2779_v3 = vld [vmem:[%s4248_s16] sm:$0xff] }
0x118a   :  { %v2630_v6 = vpop.xlane.xlu0 %2629 }
0x118b   :  { %v2634_v7 = vadd.f32 %v2630_v6, %v2615_v5 }
0x118d   :  { %v2643_v9 = vadd.f32 %v3031_v10, %v2634_v7 }
0x118f   :  { %v3032_v11 = vmul.f32 -1.442695, %v2643_v9 }
0x1191   :  { %3386 = vpow2.f32 %v3032_v11 }
0x119e   :  { %v3387_v14 = vpop.eup %3386 }
0x119f   :  { %v2651_v16 = vadd.f32 1.0, %v3387_v14  ;;  %v3037_v14 = vld [vmem:[%s4249_s17] ss:$0 sm:$0xff] }
0x11a1   :  { %3388 = vrcp.f32 %v2651_v16 }
0x11ae   :  { %v3389_v34 = vpop.eup %3388 }
0x11af   :  { %2659 = vperm.xlu1 %3345, %v3389_v34   ;;  %v2669_v37 = vsub.f32 1.0, %v3389_v34 }
0x1226   :  { %v2517_v18 = vpop.f32.mrf.mxu0 }
0x1227   :  { %v2525_v20 = vmul.f32 %v2523_v4, %v2517_v18  ;;  %v3034_v4 = vld [vmem:[#allocation22] ss:$0 sm:$0xff] }
0x1228   :  { %v3284_v21 = vpop.f32.mrf.mxu0 }
0x1229   :  { %3288 = vmatmul.mubr.msk.f32.vlgmr.msra.gmra.mxu1 %vm606_vm2, %v2525_v20 }
0x122a   :  { %v2660_v28 = vpop.permute.xlu1 %2659  ;;  %3302 = vmatpush3.msra.mxu1 %v2782_v0 }
0x122b   :  { %v2921_v30 = vmul.f32 %v2920_v22, %v2660_v28  ;;  %v2924_v31 = vmul.f32 %v2923_v24, %v2660_v28  ;;  %v2927_v33 = vmul.f32 %v2926_v25, %v2660_v28  ;;  %v2930_v35 = vmul.f32 %v2929_v63, %v2660_v28  ;;  %3303 = vmatprep.subr.mxu1 %v2781_v32 }
0x122c   :  { %v2667_v29 = vmul.f32 %v2660_v28, %v3895_v8  ;;  %3304 = vmatpush3.msra.mxu1 %v2781_v32 }
0x122d   :  { %2922 = vst.msk [vmem:[#allocation25] sm:$0xff] %vm606_vm2, %v2921_v30  ;;  %2925 = vst.msk [vmem:[#allocation25 + $0x8] sm:$0xff] %vm606_vm2, %v2924_v31 }
0x122e   :  { %2928 = vst.msk [vmem:[#allocation25 + $0x10] sm:$0xff] %vm606_vm2, %v2927_v33  ;;  %2931 = vst.msk [vmem:[#allocation25 + $0x18] sm:$0xff] %vm606_vm2, %v2930_v35 }
0x12e9   :  { %v2596_v36 = vpop.f32.mrf.mxu1 }
0x12ea   :  { %v2600_v23 = vadd.f32 %v2596_v36, %v2351_v1  ;;  %v2780_v1 = vld [vmem:[%s4248_s16 + $0x8] sm:$0xff]  ;;  %s3720_s16 = smov [#allocation25]  }
0x12eb   :  { %v3289_v26 = vpop.f32.mrf.mxu1  ;;  %3305 = vmatprep.subr.mxu1 %v2780_v1  ;;  %s2961_s17 = sshll.u32 %s3720_s16, 4  ;;  %s2962_s17 = int_to_ptr.vmem [resolvable:$true] %s2961_s17 }
0x12ec   :  { %2601 = vst.msk [vmem:[#allocation2 + $0x8] sm:$0xff] %vm233_vm0, %v2600_v23  ;;  %3306 = vmatpush3.msra.mxu1 %v2780_v1  ;;  %s3639_s1 = scalar_lea.vmem %s2962_s17, 1024  ;;  %p3644_p5 = scmp.lt.s32.totalorder %s2962_s17, %s2962_s17 }
0x12ed   :  { %3307 = vmatprep.subr.mxu1 %v2779_v3  ;;  %p3640_p4 = scmp.ne.s32.totalorder %s2962_s17, %s3639_s1  ;;  %p3645_p6 = scmp.lt.s32.totalorder %s3639_s1, %s3639_s1 }
0x12ee   :  { %3308 = vmatpush3.msra.mxu1 %v2779_v3 }
0x12ef   :  { %p3646_p7 = por %p3645_p6, %p3644_p5 }
0x12f1   :  { %p3647_p8 = pnand %p3646_p7, %p3640_p4 }
0x12f3   :  { %v2603_v51 = vld [vmem:[#allocation2 + $0x8] sm:$0xff] }
0x12f4   :  { %v2627_v38 = vmul.f32 %v3030_v57, %v2603_v51 }
0x12f6   :  { %v2631_v13 = vsel %vm233_vm0, %v2627_v38, 0.0 }
0x12f7   :  { %2632 = vadd.xlane.f32.xlu0 %v2631_v13 }
0x130d   :  { %2673 = vperm.xlu0 %3341, %v2669_v37  }
0x1380   :  { %v2633_v39 = vpop.xlane.xlu0 %2632 }
0x1381   :  { %v2635_v40 = vadd.f32 %v2633_v39, %v2618_v17 }
0x1383   :  { %v2644_v42 = vadd.f32 %v3031_v10, %v2635_v40 }
0x1385   :  { %v3033_v43 = vmul.f32 -1.442695, %v2644_v42 }
0x1387   :  { %3390 = vpow2.f32 %v3033_v43 }
0x1388   :  { %v2674_v27 = vpop.permute.xlu0 %2673 }
0x1389   :  { %v2681_v45 = vmul.f32 %v2674_v27, %v4164_v56 }
0x138b   :  { %v4181_v46 = vadd.f32 %v2681_v45, %v2667_v29 }
0x138d   :  { %3298 = vmatprep.mubr.msk.f32.mxu0 %vm233_vm0, %v4181_v46 }
0x1394   :  { %v3391_v47 = vpop.eup %3390 }
0x1395   :  { %v2652_v48 = vadd.f32 1.0, %v3391_v47 }
0x1397   :  { %3392 = vrcp.f32 %v2652_v48 }
0x13a4   :  { %v3393_v41 = vpop.eup %3392 }
0x13a5   :  { %2664 = vperm.xlu1 %3345, %v3393_v41   ;;  %v2670_v8 = vsub.f32 1.0, %v3393_v41 }
0x13a9   :  { %2678 = vperm.xlu1 %3345, %v2670_v8  }
0x1420   :  { %v2665_v2 = vpop.permute.xlu1 %2664 }
0x1421   :  { %v2933_v56 = vmul.f32 %v2932_v53, %v2665_v2  ;;  %v2936_v57 = vmul.f32 %v2935_v54, %v2665_v2  ;;  %v2939_v58 = vmul.f32 %v2938_v55, %v2665_v2  ;;  %v2942_v59 = vmul.f32 %v2941_v19, %v2665_v2 }
0x1422   :  { %v2668_v15 = vmul.f32 %v3398_v60, %v2665_v2 }
0x1423   :  { %2934 = vst.msk [vmem:[#allocation25 + $0x20] sm:$0xff] %vm606_vm2, %v2933_v56  ;;  %2937 = vst.msk [vmem:[#allocation25 + $0x28] sm:$0xff] %vm606_vm2, %v2936_v57 }
0x1424   :  { %2940 = vst.msk [vmem:[#allocation25 + $0x30] sm:$0xff] %vm606_vm2, %v2939_v58  ;;  %2943 = vst.msk [vmem:[#allocation25 + $0x38] sm:$0xff] %vm606_vm2, %v2942_v59  ;;  %v2679_v44 = vpop.permute.xlu1 %2678 }
0x1425   :  { %v2682_v61 = vmul.f32 %v2679_v44, %v2603_v51 }
0x1427   :  { %v2684_v62 = vadd.f32 %v2682_v61, %v2668_v15 }
0x1429   :  { %3299 = vmatmul.mubr.msk.f32.vlgmr.msra.gmra.mxu0 %vm233_vm0, %v2684_v62 }
0x14e9   :  { %v3300_v5 = vpop.f32.mrf.mxu0 }
0x14ea   :  { %v2774_v6 = vadd.f32 %v3300_v5, %v3034_v4 }
0x14eb   :  { %v2768_v10 = vpop.f32.mrf.mxu0 }
0x14ec   :  { %v2769_v7 = vadd.f32 %v3034_v4, %v2768_v10  ;;  %v2778_v11 = vmax.f32 %v2774_v6, 0.0 }
0x14ee   :  { %v2777_v9 = vmax.f32 %v2769_v7, 0.0 }
0x14f0   :  { %3309 = vmatprep.mubr.msk.f32.mxu1 %vm233_vm0, %v2777_v9 }
0x14f1   :  { %3310 = vmatmul.mubr.msk.f32.vlgmr.msra.gmra.mxu1 %vm233_vm0, %v2778_v11 }
0x15b1   :  { %v3311_v16 = vpop.f32.mrf.mxu1 }
0x15b2   :  { %v2868_v34 = vadd.f32 %v3311_v16, %v3037_v14 }
0x15b3   :  { %v2862_v17 = vpop.f32.mrf.mxu1 }
0x15b4   :  { %v2863_v18 = vadd.f32 %v3037_v14, %v2862_v17  ;;  %v2872_v20 = vadd.f32 %v2868_v34, %v2684_v62 }
0x15b6   :  { %v2876_v21 = vsel %vm233_vm0, %v2872_v20, 0.0  ;;  %v2871_v22 = vadd.f32 %v2863_v18, %v4181_v46 }
0x15b7   :  { %2877 = vadd.xlane.f32.xlu1 %v2876_v21 }
0x15b8   :  { %v2873_v24 = vsel %vm233_vm0, %v2871_v22, 0.0 }
0x15b9   :  { %2874 = vadd.xlane.f32.xlu0 %v2873_v24 }
0x1640   :  { %v2878_v25 = vpop.xlane.xlu1 %2877 }
0x1641   :  { %v2881_v63 = vmul.f32 0.03125, %v2878_v25 }
0x1642   :  { %v2875_v28 = vpop.xlane.xlu0 %2874 }
0x1643   :  { %v2880_v30 = vmul.f32 0.03125, %v2875_v28  ;;  %v2883_v31 = vsub.f32 %v2872_v20, %v2881_v63 }
0x1645   :  { %v2882_v33 = vsub.f32 %v2871_v22, %v2880_v30  ;;  %v2885_v23 = vmul.f32 %v2883_v31, %v2883_v31 }
0x1647   :  { %v2884_v35 = vmul.f32 %v2882_v33, %v2882_v33  ;;  %v2889_v26 = vsel %vm233_vm0, %v2885_v23, 0.0 }
0x1649   :  { %v2886_v36 = vsel %vm233_vm0, %v2884_v35, 0.0 }
0x164a   :  { %2887 = vadd.xlane.f32.xlu0 %v2886_v36 }
0x164e   :  { %2890 = vadd.xlane.f32.xlu0 %v2889_v26 }
0x164f   :  { %3650 = shalt.err (!%p3647_p8)
}
0x1650   :  { %2967 = dma.vmem_to_hbm [thread:$0]  %s2962_s17, 1024, %s4253_s21, [#allocation26], %s3699_s13, %s3699_s13, %s3700_s0  }
0x1651   :  { %v3040_v43 = vld [vmem:[%s4250_s18] ss:$0 sm:$0xff]  ;;  %s3721_s21 = smov [#allocation24]  }
0x1652   :  { %v3041_v29 = vld [vmem:[%s4251_s19] ss:$0 sm:$0xff]  ;;  %s2949_s27 = sshll.u32 %s3721_s21, 4  ;;  %s2950_s27 = int_to_ptr.vmem [resolvable:$true] %s2949_s27 }
0x1653   :  { %s3659_s11 = scalar_lea.vmem %s2950_s27, 256  ;;  %p3664_p10 = scmp.lt.s32.totalorder %s2950_s27, %s2950_s27 }
0x1654   :  { %p3660_p9 = scmp.ne.s32.totalorder %s2950_s27, %s3659_s11  ;;  %p3665_p11 = scmp.lt.s32.totalorder %s3659_s11, %s3659_s11 }
0x1656   :  { %p3666_p12 = por %p3665_p11, %p3664_p10 }
0x1658   :  { %p3667_p13 = pnand %p3666_p12, %p3660_p9 }
0x16d3   :  { %v2888_v51 = vpop.xlane.xlu0 %2887 }
0x16d4   :  { %v2892_v38 = vmul.f32 0.03125, %v2888_v51 }
0x16d6   :  { %v2894_v13 = vadd.f32 1e-05, %v2892_v38 }
0x16d7   :  { %v2891_v37 = vpop.xlane.xlu0 %2890 }
0x16d8   :  { %3394 = vrsqrt.f32 %v2894_v13  ;;  %v2893_v39 = vmul.f32 0.03125, %v2891_v37 }
0x16da   :  { %v2895_v40 = vadd.f32 1e-05, %v2893_v39 }
0x16dc   :  { %3396 = vrsqrt.f32 %v2895_v40 }
0x16e5   :  { %v3395_v42 = vpop.eup %3394 }
0x16e6   :  { %v2898_v27 = vmul.f32 %v3395_v42, %v2882_v33 }
0x16e8   :  { %v2907_v45 = vmul.f32 %v3040_v43, %v2898_v27 }
0x16e9   :  { %v3397_v46 = vpop.eup %3396 }
0x16ea   :  { %v2899_v47 = vmul.f32 %v3397_v46, %v2883_v31  ;;  %v2916_v48 = vadd.f32 %v3041_v29, %v2907_v45 }
0x16ec   :  { %v2908_v52 = vmul.f32 %v3040_v43, %v2899_v47  ;;  %2918 = vst.msk [vmem:[#allocation24] sm:$0xff] %vm233_vm0, %v2916_v48 }
0x16ee   :  { %v2917_v12 = vadd.f32 %v3041_v29, %v2908_v52 }
0x16f0   :  { %2919 = vst.msk [vmem:[#allocation24 + $0x8] sm:$0xff] %vm233_vm0, %v2917_v12 }
0x16f1   :  { %3670 = shalt.err (!%p3667_p13)
}
0x16f2   :  { %2955 = dma.vmem_to_hbm [thread:$0]  %s2950_s27, 256, %s4252_s20, [#allocation6], %s3699_s13, %s3699_s13, %s3700_s0  }
0x16f3   :  { %3693 = dma.done.wait [#allocation6], 256  }
0x16f4   :  { %3694 = vsyncadd [#allocation6], 4294967040 }
0x16f5   :  { %3695 = dma.done.wait [#allocation26], 1024  }
0x16f6   :  { %3696 = vsyncadd [#allocation26], 4294966272 }
0x16f7   :  { %2974 = vsyncpa [#allocation5], 1 }
0x16f8   :  { %2975 = vsyncpa [#allocation8], 1 }
0x16f9   :  { %2976 = vsyncpa [#allocation11], 1 }
0x16fa   :  { %2977 = vsyncpa [#allocation14], 1 }
0x16fb   :  { %2978 = vsyncpa [#allocation17], 1 }
0x16fc   :  { %2979 = vsyncpa [#allocation20], 1 }
0x16fd   :  { %2980 = vsyncpa [#allocation23], 1 }
0x16fe   :  { %2981 = vsyncpa [#allocation6], 1 }
0x16ff   :  { %2982 = vsyncpa [#allocation26], 1 }

</bundles_post_ra>
